<compile_context>
chip_gen: v5e
topology: v5e:2x2
jax: 0.10.0
libtpu: 0.0.40
codegen_flags: <defaults>
</compile_context>

<pallas_src>
import functools

import jax
import jax.numpy as jnp
from jax import lax
from jax.experimental import pallas as pl
from jax.experimental.pallas import tpu as pltpu


# ----------------------------------------------------------------------------
# Fused SAM kernel (one grid step per batch image)
# ----------------------------------------------------------------------------
def _sam_kernel(x_ref, ximg_ref, mask_ref, w12_ref, b12_ref, w3_ref, b3_ref,
                x1_ref, img_ref, *, H, W, C):
    """x_ref   : (1, C, HW)      input features, NCHW-flat (HW on lanes), f32
       ximg_ref: (1, 8, HW)      input image padded to 8 rows (rows 3..7 = 0)
       mask_ref: (9, HW)         per-tap validity masks (0 outside the image)
       w12_ref : (c12p, 9*C)     stacked [conv1; conv2] weights, col = t*C+cin
       b12_ref : (c12p, 1)       stacked [b1; b2] (zero padded)
       w3_ref  : (C, 72)         conv3 weights, col = t*8+cin (cin padded 3->8)
       b3_ref  : (C, 1)          b3
       x1_ref  : (1, C, HW)      out: conv1(x) * sigmoid(conv3(img)) + x
       img_ref : (1, 8, HW)      out: rows 0..2 = conv2(x) + x_img, rows 3..7 = 0
    """
    f32 = jnp.float32
    HW = H * W
    cdt = w12_ref.dtype                      # MXU operand dtype (bf16 or f32)

    # Tap t = ky*3+kx of a padding=1 3x3 conv reads input pixel p + s_t.
    shifts = [(ky - 1) * W + (kx - 1) for ky in range(3) for kx in range(3)]

    def im2col(a):
        # a: (rows, HW) f32 -> (9*rows, HW) in cdt.  Each tap is an XLU lane
        # rotation of the whole slab (co-issues with MXU/VPU); wrapped lanes
        # (reads outside the image) are zeroed by the precomputed mask.
        pieces = []
        for t, s in enumerate(shifts):
            if s == 0:                               # center tap: untouched
                pieces.append(a)
            else:
                p = pltpu.roll(a, (-s) % HW, axis=1)
                pieces.append(p * mask_ref[t:t + 1, :])
        return jnp.concatenate(pieces, axis=0).astype(cdt)

    x_f32 = x_ref[0]                                          # (C, HW) f32

    # ---- conv1 (C->C) + conv2 (C->3): single MXU matmul, K = 9*C ----------
    patches12 = im2col(x_f32)                                 # (9C, HW)
    acc12 = jnp.dot(w12_ref[...], patches12,
                    preferred_element_type=f32) + b12_ref[...]  # (c12p, HW)

    x1_lin = acc12[:C, :]                                     # conv1(x)
    img8 = acc12[C:C + 8, :] + ximg_ref[0]     # rows 0..2 = conv2(x)+x_img
    img_ref[0] = img8                          # 8-sublane unmasked store

    # ---- conv3 (3->C): im2col the 8-row img slab -> one MXU matmul --------
    patches3 = im2col(img8)                                   # (72, HW)
    z3 = jnp.dot(w3_ref[...], patches3,
                 preferred_element_type=f32) + b3_ref[...]    # (C, HW)

    denom = 1.0 + jnp.exp(-z3)                                # EUP exp
    if w12_ref.dtype == jnp.bfloat16:
        gate = pl.reciprocal(denom, approx=True)              # EUP rcp (fast path)
    else:
        gate = 1.0 / denom                                    # exact (strict f32 path)

    # ---- gate + residual folded into the final lane-dense store -----------
    x1_ref[0] = x1_lin * gate + x_f32


# ----------------------------------------------------------------------------
# Host-side parameter prep: torch (Cout, Cin, kH, kW) -> im2col weight slabs
# ----------------------------------------------------------------------------
def _round_up(v, m):
    return ((v + m - 1) // m) * m


def _prep_params(p, n_feat, compute_dtype):
    C = n_feat
    sub = 16 if compute_dtype == jnp.bfloat16 else 8      # sublane packing
    c12 = C + 3
    c12p = max(_round_up(c12, sub), C + 8)                 # >= C+8 for img8 slice
    w_cat = jnp.concatenate([p["w1"], p["w2"]], axis=0)    # (C+3, C, 3, 3)
    w_cat = jnp.pad(w_cat, ((0, c12p - c12), (0, 0), (0, 0), (0, 0)))
    # Column order must match im2col: col = t*C + cin, t = ky*3 + kx.
    w12 = jnp.transpose(w_cat, (0, 2, 3, 1)).reshape(c12p, 9 * C)
    b12 = jnp.concatenate([p["b1"], p["b2"],
                           jnp.zeros((c12p - c12,), jnp.float32)]).reshape(c12p, 1)
    # conv3: col = t*8 + cin (cin padded 3 -> 8, matching the 8-row img slab).
    w3 = jnp.transpose(p["w3"], (0, 2, 3, 1)).reshape(C, 9, 3)
    w3 = jnp.pad(w3, ((0, 0), (0, 0), (0, 5))).reshape(C, 72)
    b3 = p["b3"].reshape(C, 1)
    return (w12.astype(compute_dtype), b12.astype(jnp.float32),
            w3.astype(compute_dtype), b3.astype(jnp.float32))


# ----------------------------------------------------------------------------
# Wrapper
# ----------------------------------------------------------------------------
def sam_forward(x, x_img, params, *, compute_dtype=jnp.bfloat16):
    """SAM forward. x: (N, n_feat, H, W), x_img: (N, 3, H, W). Returns (x1, img)."""
    N, C, H, W = x.shape
    assert C % 8 == 0, "n_feat must be a multiple of 8 (sublane alignment)"
    HW = H * W

    w12, b12, w3, b3 = _prep_params(params, C, compute_dtype)
    c12p = w12.shape[0]

    # Activations stay NCHW-flat so HW sits on the lane axis.  x / x_img are
    # kept f32 so the residual adds match the reference exactly; the kernel
    # casts the matmul operands to compute_dtype internally.
    x_flat = x.reshape(N, C, HW).astype(jnp.float32)
    ximg8 = jnp.concatenate(
        [x_img.reshape(N, 3, HW), jnp.zeros((N, 5, HW), x_img.dtype)],
        axis=1).astype(jnp.float32)                            # (N, 8, HW)

    # Per-tap validity masks: zero where a 3x3 tap would read outside the image
    # (kills both the row-wrap of the +-1 column shifts and the lane-roll wrap).
    row = jnp.arange(HW, dtype=jnp.int32) // W
    col = jnp.arange(HW, dtype=jnp.int32) % W
    masks = []
    for ky in range(3):
        for kx in range(3):
            dy, dx = ky - 1, kx - 1
            masks.append((row + dy >= 0) & (row + dy < H)
                         & (col + dx >= 0) & (col + dx < W))
    mask9 = jnp.stack(masks).astype(jnp.float32)               # (9, HW)

    kern = functools.partial(_sam_kernel, H=H, W=W, C=C)
    x1_flat, img8_flat = pl.pallas_call(
        kern,
        out_shape=(jax.ShapeDtypeStruct((N, C, HW), jnp.float32),
                   jax.ShapeDtypeStruct((N, 8, HW), jnp.float32)),
        grid=(N,),
        in_specs=[
            pl.BlockSpec((1, C, HW), lambda n: (n, 0, 0)),
            pl.BlockSpec((1, 8, HW), lambda n: (n, 0, 0)),
            pl.BlockSpec((9, HW), lambda n: (0, 0)),
            pl.BlockSpec((c12p, 9 * C), lambda n: (0, 0)),
            pl.BlockSpec((c12p, 1), lambda n: (0, 0)),
            pl.BlockSpec((C, 72), lambda n: (0, 0)),
            pl.BlockSpec((C, 1), lambda n: (0, 0)),
        ],
        out_specs=(
            pl.BlockSpec((1, C, HW), lambda n: (n, 0, 0)),
            pl.BlockSpec((1, 8, HW), lambda n: (n, 0, 0)),
        ),
        compiler_params=pltpu.CompilerParams(
            dimension_semantics=("parallel",)),
    )(x_flat, ximg8, mask9, w12, b12, w3, b3)

    x1 = x1_flat.reshape(N, C, H, W)
    img = img8_flat[:, :3, :].reshape(N, 3, H, W)
    return x1, img


# ----------------------------------------------------------------------------
# Deterministic synthetic parameters (PyTorch Conv2d layouts)
# ----------------------------------------------------------------------------
def init_params(key, n_feat, scale=0.05):
    ks = jax.random.split(key, 6)
    return {
        "w1": scale * jax.random.normal(ks[0], (n_feat, n_feat, 3, 3), jnp.float32),
        "b1": scale * jax.random.normal(ks[1], (n_feat,), jnp.float32),
        "w2": scale * jax.random.normal(ks[2], (3, n_feat, 3, 3), jnp.float32),
        "b2": scale * jax.random.normal(ks[3], (3,), jnp.float32),
        "w3": scale * jax.random.normal(ks[4], (n_feat, 3, 3, 3), jnp.float32),
        "b3": scale * jax.random.normal(ks[5], (n_feat,), jnp.float32),
    }


# ----------------------------------------------------------------------------
# Pure-JAX reference (correctness check only)
# ----------------------------------------------------------------------------
def _ref_sam(x, x_img, p):
    def conv3x3(inp, w, b):
        y = lax.conv_general_dilated(
            inp, w, window_strides=(1, 1), padding=[(1, 1), (1, 1)],
            dimension_numbers=("NCHW", "OIHW", "NCHW"))
        return y + b.reshape(1, -1, 1, 1)

    x1 = conv3x3(x, p["w1"], p["b1"])
    img = conv3x3(x, p["w2"], p["b2"]) + x_img
    x2 = jax.nn.sigmoid(conv3x3(img, p["w3"], p["b3"]))
    return x1 * x2 + x, img


# ----------------------------------------------------------------------------
if __name__ == "__main__":
    key = jax.random.PRNGKey(0)
    k_x, k_i, k_p = jax.random.split(key, 3)

    N, N_FEAT, H, W = 2, 32, 16, 16
    x = jax.random.normal(k_x, (N, N_FEAT, H, W), dtype=jnp.float32)
    x_img = jax.random.normal(k_i, (N, 3, H, W), dtype=jnp.float32)
    params = init_params(k_p, N_FEAT)

    x1_ref, img_ref = _ref_sam(x, x_img, params)

    # Strict-precision path (f32 MXU operands, exact sigmoid divide).
    x1, img = jax.block_until_ready(
        sam_forward(x, x_img, params, compute_dtype=jnp.float32))
    assert x1.shape == (N, N_FEAT, H, W) and img.shape == (N, 3, H, W)
    assert jnp.allclose(img, img_ref, rtol=1e-3, atol=1e-3), "img mismatch (f32)"
    assert jnp.allclose(x1, x1_ref, rtol=1e-3, atol=1e-3), "x1 mismatch (f32)"

    # Default fast path (bf16 MXU operands, f32 accumulation, approx EUP rcp).
    x1b, imgb = jax.block_until_ready(sam_forward(x, x_img, params))
    assert jnp.allclose(imgb, img_ref, rtol=3e-2, atol=3e-2), "img mismatch (bf16)"
    assert jnp.allclose(x1b, x1_ref, rtol=3e-2, atol=3e-2), "x1 mismatch (bf16)"

    print("KERNEL_OK")
</pallas_src>

<mosaic_0001>
module attributes {stable_mosaic.version = 11 : i64} {
  func.func @_sam_kernel(%arg0: i32, %arg1: memref<1x32x256xf32, #tpu.memory_space<vmem>>, %arg2: memref<1x8x256xf32, #tpu.memory_space<vmem>>, %arg3: memref<9x256xf32, #tpu.memory_space<vmem>>, %arg4: memref<40x288xf32, #tpu.memory_space<vmem>>, %arg5: memref<40x1xf32, #tpu.memory_space<vmem>>, %arg6: memref<32x72xf32, #tpu.memory_space<vmem>>, %arg7: memref<32x1xf32, #tpu.memory_space<vmem>>, %arg8: memref<1x32x256xf32, #tpu.memory_space<vmem>>, %arg9: memref<1x8x256xf32, #tpu.memory_space<vmem>>) attributes {dimension_semantics = [#tpu.dimension_semantics<parallel>], iteration_bounds = array<i64: 2>, scalar_prefetch = 0 : i64, scratch_operands = 0 : i64, tpu.core_type = #tpu.core_type<tc>, window_params = [{transform_indices = @transform_0, window_bounds = array<i64: 1, 32, 256>}, {transform_indices = @transform_1, window_bounds = array<i64: 1, 8, 256>}, {pipeline_mode = #tpu.pipeline_mode<synchronous>, transform_indices = @transform_2, window_bounds = array<i64: 9, 256>}, {pipeline_mode = #tpu.pipeline_mode<synchronous>, transform_indices = @transform_3, window_bounds = array<i64: 40, 288>}, {pipeline_mode = #tpu.pipeline_mode<synchronous>, transform_indices = @transform_4, window_bounds = array<i64: 40, 1>}, {pipeline_mode = #tpu.pipeline_mode<synchronous>, transform_indices = @transform_5, window_bounds = array<i64: 32, 72>}, {pipeline_mode = #tpu.pipeline_mode<synchronous>, transform_indices = @transform_6, window_bounds = array<i64: 32, 1>}, {transform_indices = @transform_7, window_bounds = array<i64: 1, 32, 256>}, {transform_indices = @transform_8, window_bounds = array<i64: 1, 8, 256>}]} {
    %c0 = arith.constant 0 : index
    %c0_0 = arith.constant 0 : index
    %c0_1 = arith.constant 0 : index
    %0 = vector.load %arg1[%c0, %c0_0, %c0_1] : memref<1x32x256xf32, #tpu.memory_space<vmem>>, vector<1x32x256xf32>
    %1 = vector.shape_cast %0 : vector<1x32x256xf32> to vector<32x256xf32>
    %c17_i32 = arith.constant 17 : i32
    %2 = tpu.dynamic_rotate %1 by %c17_i32 dim 1 : vector<32x256xf32>, i32 -> vector<32x256xf32>
    %c0_2 = arith.constant 0 : index
    %c0_3 = arith.constant 0 : index
    %3 = vector.load %arg3[%c0_2, %c0_3] : memref<9x256xf32, #tpu.memory_space<vmem>>, vector<1x256xf32>
    %4 = vector.broadcast %3 : vector<1x256xf32> to vector<32x256xf32>
    %5 = arith.mulf %2, %4 : vector<32x256xf32>
    %c16_i32 = arith.constant 16 : i32
    %6 = tpu.dynamic_rotate %1 by %c16_i32 dim 1 : vector<32x256xf32>, i32 -> vector<32x256xf32>
    %c1 = arith.constant 1 : index
    %c0_4 = arith.constant 0 : index
    %7 = vector.load %arg3[%c1, %c0_4] : memref<9x256xf32, #tpu.memory_space<vmem>>, vector<1x256xf32>
    %8 = vector.broadcast %7 : vector<1x256xf32> to vector<32x256xf32>
    %9 = arith.mulf %6, %8 : vector<32x256xf32>
    %c15_i32 = arith.constant 15 : i32
    %10 = tpu.dynamic_rotate %1 by %c15_i32 dim 1 : vector<32x256xf32>, i32 -> vector<32x256xf32>
    %c2 = arith.constant 2 : index
    %c0_5 = arith.constant 0 : index
    %11 = vector.load %arg3[%c2, %c0_5] : memref<9x256xf32, #tpu.memory_space<vmem>>, vector<1x256xf32>
    %12 = vector.broadcast %11 : vector<1x256xf32> to vector<32x256xf32>
    %13 = arith.mulf %10, %12 : vector<32x256xf32>
    %c1_i32 = arith.constant 1 : i32
    %14 = tpu.dynamic_rotate %1 by %c1_i32 dim 1 : vector<32x256xf32>, i32 -> vector<32x256xf32>
    %c3 = arith.constant 3 : index
    %c0_6 = arith.constant 0 : index
    %15 = vector.load %arg3[%c3, %c0_6] : memref<9x256xf32, #tpu.memory_space<vmem>>, vector<1x256xf32>
    %16 = vector.broadcast %15 : vector<1x256xf32> to vector<32x256xf32>
    %17 = arith.mulf %14, %16 : vector<32x256xf32>
    %c255_i32 = arith.constant 255 : i32
    %18 = tpu.dynamic_rotate %1 by %c255_i32 dim 1 : vector<32x256xf32>, i32 -> vector<32x256xf32>
    %c5 = arith.constant 5 : index
    %c0_7 = arith.constant 0 : index
    %19 = vector.load %arg3[%c5, %c0_7] : memref<9x256xf32, #tpu.memory_space<vmem>>, vector<1x256xf32>
    %20 = vector.broadcast %19 : vector<1x256xf32> to vector<32x256xf32>
    %21 = arith.mulf %18, %20 : vector<32x256xf32>
    %c241_i32 = arith.constant 241 : i32
    %22 = tpu.dynamic_rotate %1 by %c241_i32 dim 1 : vector<32x256xf32>, i32 -> vector<32x256xf32>
    %c6 = arith.constant 6 : index
    %c0_8 = arith.constant 0 : index
    %23 = vector.load %arg3[%c6, %c0_8] : memref<9x256xf32, #tpu.memory_space<vmem>>, vector<1x256xf32>
    %24 = vector.broadcast %23 : vector<1x256xf32> to vector<32x256xf32>
    %25 = arith.mulf %22, %24 : vector<32x256xf32>
    %c240_i32 = arith.constant 240 : i32
    %26 = tpu.dynamic_rotate %1 by %c240_i32 dim 1 : vector<32x256xf32>, i32 -> vector<32x256xf32>
    %c7 = arith.constant 7 : index
    %c0_9 = arith.constant 0 : index
    %27 = vector.load %arg3[%c7, %c0_9] : memref<9x256xf32, #tpu.memory_space<vmem>>, vector<1x256xf32>
    %28 = vector.broadcast %27 : vector<1x256xf32> to vector<32x256xf32>
    %29 = arith.mulf %26, %28 : vector<32x256xf32>
    %c239_i32 = arith.constant 239 : i32
    %30 = tpu.dynamic_rotate %1 by %c239_i32 dim 1 : vector<32x256xf32>, i32 -> vector<32x256xf32>
    %c8 = arith.constant 8 : index
    %c0_10 = arith.constant 0 : index
    %31 = vector.load %arg3[%c8, %c0_10] : memref<9x256xf32, #tpu.memory_space<vmem>>, vector<1x256xf32>
    %32 = vector.broadcast %31 : vector<1x256xf32> to vector<32x256xf32>
    %33 = arith.mulf %30, %32 : vector<32x256xf32>
    %34 = tpu.concatenate %5, %9, %13, %17, %1, %21, %25, %29, %33 in 0 : vector<32x256xf32>, vector<32x256xf32>, vector<32x256xf32>, vector<32x256xf32>, vector<32x256xf32>, vector<32x256xf32>, vector<32x256xf32>, vector<32x256xf32>, vector<32x256xf32> -> vector<288x256xf32>
    %c0_11 = arith.constant 0 : index
    %c0_12 = arith.constant 0 : index
    %35 = vector.load %arg4[%c0_11, %c0_12] : memref<40x288xf32, #tpu.memory_space<vmem>>, vector<40x288xf32>
    %cst = arith.constant dense<0.000000e+00> : vector<40x256xf32>
    %36 = tpu.matmul %35, %34, %cst {dimension_numbers = #tpu.dot_dimension_numbers<[1], [0], [0], [1], [0, 0, 1, 1], [], []>} : vector<40x288xf32>, vector<288x256xf32>, vector<40x256xf32> -> vector<40x256xf32>
    %c0_13 = arith.constant 0 : index
    %c0_14 = arith.constant 0 : index
    %37 = vector.load %arg5[%c0_13, %c0_14] : memref<40x1xf32, #tpu.memory_space<vmem>>, vector<40x1xf32>
    %38 = vector.broadcast %37 : vector<40x1xf32> to vector<40x256xf32>
    %39 = arith.addf %36, %38 : vector<40x256xf32>
    %40 = vector.extract_strided_slice %39 {offsets = [0, 0], sizes = [32, 256], strides = [1, 1]} : vector<40x256xf32> to vector<32x256xf32>
    %41 = vector.extract_strided_slice %39 {offsets = [32, 0], sizes = [8, 256], strides = [1, 1]} : vector<40x256xf32> to vector<8x256xf32>
    %c0_15 = arith.constant 0 : index
    %c0_16 = arith.constant 0 : index
    %c0_17 = arith.constant 0 : index
    %42 = vector.load %arg2[%c0_15, %c0_16, %c0_17] : memref<1x8x256xf32, #tpu.memory_space<vmem>>, vector<1x8x256xf32>
    %43 = vector.shape_cast %42 : vector<1x8x256xf32> to vector<8x256xf32>
    %44 = arith.addf %41, %43 : vector<8x256xf32>
    %c0_18 = arith.constant 0 : index
    %c0_19 = arith.constant 0 : index
    %c0_20 = arith.constant 0 : index
    %45 = vector.load %arg9[%c0_18, %c0_19, %c0_20] : memref<1x8x256xf32, #tpu.memory_space<vmem>>, vector<1x8x256xf32>
    %46 = vector.shape_cast %45 : vector<1x8x256xf32> to vector<8x256xf32>
    %47 = vector.shape_cast %44 : vector<8x256xf32> to vector<1x8x256xf32>
    tpu.vector_store %arg9[%c0_18, %c0_19, %c0_20], %47 {strides = array<i32>} : memref<1x8x256xf32, #tpu.memory_space<vmem>>, vector<1x8x256xf32>,
    %c17_i32_21 = arith.constant 17 : i32
    %48 = tpu.dynamic_rotate %44 by %c17_i32_21 dim 1 : vector<8x256xf32>, i32 -> vector<8x256xf32>
    %c0_22 = arith.constant 0 : index
    %c0_23 = arith.constant 0 : index
    %49 = vector.load %arg3[%c0_22, %c0_23] : memref<9x256xf32, #tpu.memory_space<vmem>>, vector<1x256xf32>
    %50 = vector.broadcast %49 : vector<1x256xf32> to vector<8x256xf32>
    %51 = arith.mulf %48, %50 : vector<8x256xf32>
    %c16_i32_24 = arith.constant 16 : i32
    %52 = tpu.dynamic_rotate %44 by %c16_i32_24 dim 1 : vector<8x256xf32>, i32 -> vector<8x256xf32>
    %c1_25 = arith.constant 1 : index
    %c0_26 = arith.constant 0 : index
    %53 = vector.load %arg3[%c1_25, %c0_26] : memref<9x256xf32, #tpu.memory_space<vmem>>, vector<1x256xf32>
    %54 = vector.broadcast %53 : vector<1x256xf32> to vector<8x256xf32>
    %55 = arith.mulf %52, %54 : vector<8x256xf32>
    %c15_i32_27 = arith.constant 15 : i32
    %56 = tpu.dynamic_rotate %44 by %c15_i32_27 dim 1 : vector<8x256xf32>, i32 -> vector<8x256xf32>
    %c2_28 = arith.constant 2 : index
    %c0_29 = arith.constant 0 : index
    %57 = vector.load %arg3[%c2_28, %c0_29] : memref<9x256xf32, #tpu.memory_space<vmem>>, vector<1x256xf32>
    %58 = vector.broadcast %57 : vector<1x256xf32> to vector<8x256xf32>
    %59 = arith.mulf %56, %58 : vector<8x256xf32>
    %c1_i32_30 = arith.constant 1 : i32
    %60 = tpu.dynamic_rotate %44 by %c1_i32_30 dim 1 : vector<8x256xf32>, i32 -> vector<8x256xf32>
    %c3_31 = arith.constant 3 : index
    %c0_32 = arith.constant 0 : index
    %61 = vector.load %arg3[%c3_31, %c0_32] : memref<9x256xf32, #tpu.memory_space<vmem>>, vector<1x256xf32>
    %62 = vector.broadcast %61 : vector<1x256xf32> to vector<8x256xf32>
    %63 = arith.mulf %60, %62 : vector<8x256xf32>
    %c255_i32_33 = arith.constant 255 : i32
    %64 = tpu.dynamic_rotate %44 by %c255_i32_33 dim 1 : vector<8x256xf32>, i32 -> vector<8x256xf32>
    %c5_34 = arith.constant 5 : index
    %c0_35 = arith.constant 0 : index
    %65 = vector.load %arg3[%c5_34, %c0_35] : memref<9x256xf32, #tpu.memory_space<vmem>>, vector<1x256xf32>
    %66 = vector.broadcast %65 : vector<1x256xf32> to vector<8x256xf32>
    %67 = arith.mulf %64, %66 : vector<8x256xf32>
    %c241_i32_36 = arith.constant 241 : i32
    %68 = tpu.dynamic_rotate %44 by %c241_i32_36 dim 1 : vector<8x256xf32>, i32 -> vector<8x256xf32>
    %c6_37 = arith.constant 6 : index
    %c0_38 = arith.constant 0 : index
    %69 = vector.load %arg3[%c6_37, %c0_38] : memref<9x256xf32, #tpu.memory_space<vmem>>, vector<1x256xf32>
    %70 = vector.broadcast %69 : vector<1x256xf32> to vector<8x256xf32>
    %71 = arith.mulf %68, %70 : vector<8x256xf32>
    %c240_i32_39 = arith.constant 240 : i32
    %72 = tpu.dynamic_rotate %44 by %c240_i32_39 dim 1 : vector<8x256xf32>, i32 -> vector<8x256xf32>
    %c7_40 = arith.constant 7 : index
    %c0_41 = arith.constant 0 : index
    %73 = vector.load %arg3[%c7_40, %c0_41] : memref<9x256xf32, #tpu.memory_space<vmem>>, vector<1x256xf32>
    %74 = vector.broadcast %73 : vector<1x256xf32> to vector<8x256xf32>
    %75 = arith.mulf %72, %74 : vector<8x256xf32>
    %c239_i32_42 = arith.constant 239 : i32
    %76 = tpu.dynamic_rotate %44 by %c239_i32_42 dim 1 : vector<8x256xf32>, i32 -> vector<8x256xf32>
    %c8_43 = arith.constant 8 : index
    %c0_44 = arith.constant 0 : index
    %77 = vector.load %arg3[%c8_43, %c0_44] : memref<9x256xf32, #tpu.memory_space<vmem>>, vector<1x256xf32>
    %78 = vector.broadcast %77 : vector<1x256xf32> to vector<8x256xf32>
    %79 = arith.mulf %76, %78 : vector<8x256xf32>
    %80 = tpu.concatenate %51, %55, %59, %63, %44, %67, %71, %75, %79 in 0 : vector<8x256xf32>, vector<8x256xf32>, vector<8x256xf32>, vector<8x256xf32>, vector<8x256xf32>, vector<8x256xf32>, vector<8x256xf32>, vector<8x256xf32>, vector<8x256xf32> -> vector<72x256xf32>
    %c0_45 = arith.constant 0 : index
    %c0_46 = arith.constant 0 : index
    %81 = vector.load %arg6[%c0_45, %c0_46] : memref<32x72xf32, #tpu.memory_space<vmem>>, vector<32x72xf32>
    %cst_47 = arith.constant dense<0.000000e+00> : vector<32x256xf32>
    %82 = tpu.matmul %81, %80, %cst_47 {dimension_numbers = #tpu.dot_dimension_numbers<[1], [0], [0], [1], [0, 0, 1, 1], [], []>} : vector<32x72xf32>, vector<72x256xf32>, vector<32x256xf32> -> vector<32x256xf32>
    %c0_48 = arith.constant 0 : index
    %c0_49 = arith.constant 0 : index
    %83 = vector.load %arg7[%c0_48, %c0_49] : memref<32x1xf32, #tpu.memory_space<vmem>>, vector<32x1xf32>
    %84 = vector.broadcast %83 : vector<32x1xf32> to vector<32x256xf32>
    %85 = arith.addf %82, %84 : vector<32x256xf32>
    %cst_50 = arith.constant 0.000000e+00 : f32
    %86 = vector.broadcast %cst_50 : f32 to vector<32x256xf32>
    %87 = arith.subf %86, %85 : vector<32x256xf32>
    %88 = math.exp %87 : vector<32x256xf32>
    %cst_51 = arith.constant 1.000000e+00 : f32
    %89 = vector.broadcast %cst_51 : f32 to vector<32x256xf32>
    %90 = arith.addf %89, %88 : vector<32x256xf32>
    %cst_52 = arith.constant 1.000000e+00 : f32
    %91 = vector.broadcast %cst_52 : f32 to vector<32x256xf32>
    %92 = arith.divf %91, %90 : vector<32x256xf32>
    %93 = arith.mulf %40, %92 : vector<32x256xf32>
    %94 = arith.addf %93, %1 : vector<32x256xf32>
    %c0_53 = arith.constant 0 : index
    %c0_54 = arith.constant 0 : index
    %c0_55 = arith.constant 0 : index
    %95 = vector.load %arg8[%c0_53, %c0_54, %c0_55] : memref<1x32x256xf32, #tpu.memory_space<vmem>>, vector<1x32x256xf32>
    %96 = vector.shape_cast %95 : vector<1x32x256xf32> to vector<32x256xf32>
    %97 = vector.shape_cast %94 : vector<32x256xf32> to vector<1x32x256xf32>
    tpu.vector_store %arg8[%c0_53, %c0_54, %c0_55], %97 {strides = array<i32>} : memref<1x32x256xf32, #tpu.memory_space<vmem>>, vector<1x32x256xf32>,
    return
  }
  func.func @transform_0(%arg0: i32) -> (i32, i32, i32) {
    %c0_i32 = arith.constant 0 : i32
    %c0_i32_0 = arith.constant 0 : i32
    %c0_i32_1 = arith.constant 0 : i32
    return %arg0, %c0_i32, %c0_i32_0 : i32, i32, i32
  }
  func.func @transform_1(%arg0: i32) -> (i32, i32, i32) {
    %c0_i32 = arith.constant 0 : i32
    %c0_i32_0 = arith.constant 0 : i32
    %c0_i32_1 = arith.constant 0 : i32
    return %arg0, %c0_i32, %c0_i32_0 : i32, i32, i32
  }
  func.func @transform_2(%arg0: i32) -> (i32, i32) {
    %c0_i32 = arith.constant 0 : i32
    %c0_i32_0 = arith.constant 0 : i32
    %c0_i32_1 = arith.constant 0 : i32
    return %c0_i32, %c0_i32_0 : i32, i32
  }
  func.func @transform_3(%arg0: i32) -> (i32, i32) {
    %c0_i32 = arith.constant 0 : i32
    %c0_i32_0 = arith.constant 0 : i32
    %c0_i32_1 = arith.constant 0 : i32
    return %c0_i32, %c0_i32_0 : i32, i32
  }
  func.func @transform_4(%arg0: i32) -> (i32, i32) {
    %c0_i32 = arith.constant 0 : i32
    %c0_i32_0 = arith.constant 0 : i32
    %c0_i32_1 = arith.constant 0 : i32
    return %c0_i32, %c0_i32_0 : i32, i32
  }
  func.func @transform_5(%arg0: i32) -> (i32, i32) {
    %c0_i32 = arith.constant 0 : i32
    %c0_i32_0 = arith.constant 0 : i32
    %c0_i32_1 = arith.constant 0 : i32
    return %c0_i32, %c0_i32_0 : i32, i32
  }
  func.func @transform_6(%arg0: i32) -> (i32, i32) {
    %c0_i32 = arith.constant 0 : i32
    %c0_i32_0 = arith.constant 0 : i32
    %c0_i32_1 = arith.constant 0 : i32
    return %c0_i32, %c0_i32_0 : i32, i32
  }
  func.func @transform_7(%arg0: i32) -> (i32, i32, i32) {
    %c0_i32 = arith.constant 0 : i32
    %c0_i32_0 = arith.constant 0 : i32
    %c0_i32_1 = arith.constant 0 : i32
    return %arg0, %c0_i32, %c0_i32_0 : i32, i32, i32
  }
  func.func @transform_8(%arg0: i32) -> (i32, i32, i32) {
    %c0_i32 = arith.constant 0 : i32
    %c0_i32_0 = arith.constant 0 : i32
    %c0_i32_1 = arith.constant 0 : i32
    return %arg0, %c0_i32, %c0_i32_0 : i32, i32, i32
  }
}

</mosaic_0001>

<bundles_post_ra>
// kernel: tpu_custom_call.1
= control target key start
LH: loop header
LB: loop body
LE: loop exit
PB: predicated region body
PF: predicated region fallthrough
CT: control target
= control target key end

     0   :  { %s2853_s0 = inlined_call_operand.hbm [shape: f32[2,32,256], index: 0, kind: input, shape index: {}]   ;;  %s2854_s1 = inlined_call_operand.vmem [shape: f32[2,8,256], index: 1, kind: input, shape index: {}]   ;;  %s2855_s2 = inlined_call_operand.vmem [shape: f32[9,256], index: 2, kind: input, shape index: {}]   ;;  %s2856_s3 = inlined_call_operand.hbm [shape: f32[40,288], index: 3, kind: input, shape index: {}]   ;;  %s2857_s4 = inlined_call_operand.vmem [shape: f32[40,1], index: 4, kind: input, shape index: {}]   ;;  %s2858_s5 = inlined_call_operand.hbm [shape: f32[32,72], index: 5, kind: input, shape index: {}]   ;;  %s2859_s6 = inlined_call_operand.vmem [shape: f32[32,1], index: 6, kind: input, shape index: {}]   ;;  %s2860_s7 = inlined_call_operand.hbm [shape: f32[2,32,256], index: 7, kind: output, shape index: {0}]   ;;  %s2861_s8 = inlined_call_operand.hbm [shape: f32[2,8,256], index: 8, kind: output, shape index: {1}]  }
   0x1   :  { %2866 = sst [smem:[#allocation15_spill]] %s2853_s0 }
   0x2   :  { %2867 = sst [smem:[#allocation16_spill]] %s2854_s1 }
   0x3   :  { %2868 = sst [smem:[#allocation17_spill]] %s2856_s3 }
   0x4   :  { %2869 = sst [smem:[#allocation18_spill]] %s2858_s5 }
   0x5   :  { %14 = vsyncpa [#allocation3], 0 }
   0x6   :  { %16 = vsyncpa [#allocation3 + $0x1], 0 }
   0x7   :  { %17 = vsyncpa [#allocation6], 0 }
   0x8   :  { %18 = vsyncpa [#allocation4], 0 }
   0x9   :  { %20 = vsyncpa [#allocation4 + $0x1], 0 }
   0xa   :  { %21 = vsyncpa [#allocation10], 0 }
   0xb   :  { %23 = vsyncpa [#allocation10 + $0x1], 0  ;;  %s1990_s27 = smov 0   ;;  %s1992_s28 = smov 0  }
   0xc   :  { %s1994_s29 = smov 0   ;;  %s1996_s30 = smov 0  }
   0xd LB: > { %s2011_s9 = sadd.s32 4294967295, %s1925_s30   ;;  %s1538_s10 = sadd.s32 4294967294, %s1925_s30   ;;  %s1925_s30 = sphi %s1996_s30, %s2886_s30   ;;  %s1921_s29 = sphi %s1994_s29, %s2885_s29   ;;  %s1917_s28 = sphi %s1992_s28, %s2884_s28   ;;  %s1913_s27 = sphi %s1990_s27, %s2883_s27  }
   0xe   : > { %p49_p0 = scmp.ne.s32.totalorder %s1917_s28, %s1913_s27  ;;  %p50_p1 = scmp.eq.s32.totalorder %s2011_s9, 0 }
   0xf   : > { %p204_p2 = scmp.eq.s32.totalorder %s2011_s9, 1  ;;  %p210_p3 = scmp.eq.s32.totalorder %s1538_s10, 1 }
  0x10   : > { %p2020_p4 = por %p50_p1, %p49_p0  ;;  %p1539_p5 = scmp.ge.s32.totalorder %s1925_s30, 1 }
  0x11   : > { %p2025_p6 = por %p210_p3, %p49_p0  ;;  %p243_p7 = scmp.lt.s32.totalorder %s1925_s30, 3 }
  0x12   : > { %s2872_s3 = sld [smem:[#allocation17_spill]]  ;;  %s1927_s17 = smov [#allocation5]  }
  0x13   : > { %p2033_p8 = pnand %p1539_p5, %p243_p7  ;;  %s259_s18 = sshll.u32 %s1927_s17, 4  ;;  %s260_s18 = int_to_ptr.vmem [resolvable:$true] %s259_s18 }
  0x14   : > { %s2874_s5 = sld [smem:[#allocation18_spill]]  ;;  %s1928_s22 = smov 384  }
  0x15   : > { %p1616_p9 = pneg %p2033_p8  ;;  %s1929_s23 = smov 24  }
  0x16   : > { %s1930_s24 = smov [#allocation7]   ;;  %s1931_s26 = smov 128  }
  0x17   : > { %p1617_p10 = pnand %p1616_p9, %p50_p1  ;;  %s276_s25 = sshll.u32 %s1930_s24, 4  ;;  %s277_s25 = int_to_ptr.vmem [resolvable:$true] %s276_s25 }
  0x18   : > { %s257_s15 = sshll.u32 %s2872_s3, 4  ;;  %s1932_s10 = smov 8   ;;  %s258_s15 = int_to_ptr.hbm [resolvable:$true] %s257_s15 }
  0x19   : > { %1619 = dma.hbm_to_vmem [thread:$0]  (!%p1617_p10), %s258_s15, 1920, %s260_s18, [#allocation6], %s1928_s22, %s1928_s22, %s1929_s23  }
  0x1a   : > { %s274_s21 = sshll.u32 %s2874_s5, 4  ;;  %s2046_s13 = sadd.s32 1, %s1925_s30   ;;  %s275_s21 = int_to_ptr.hbm [resolvable:$true] %s274_s21 }
  0x1b   : > { %1622 = dma.hbm_to_vmem [thread:$0]  (!%p1617_p10), %s275_s21, 512, %s277_s25, [#allocation6], %s1931_s26, %s1931_s26, %s1932_s10  }
  0x1c   : > { %s33_s14 = ssub.s32 %s1925_s30, %s2046_s13  ;;  %s36_s17 = sadd.s32 1, %s1921_s29 }
  0x1d   : > { %p34_p12 = scmp.eq.s32.totalorder %s33_s14, 0  ;;  %p43_p13 = scmp.ne.s32.totalorder %s1921_s29, %s1917_s28 }
  0x1e   : > { %p44_p0 = scmp.eq.s32.totalorder %s1925_s30, 0  ;;  %p1636_p7 = scmp.lt.s32.totalorder %s1925_s30, 2 }
  0x1f   : > { %s2055_s19 = scalar_select %p34_p12, %s1921_s29, %s36_s17  }
  0x20   : > { %p45_p3 = por %p44_p0, %p43_p13  ;;  %p2059_p5 = por %p204_p2, %p43_p13 }
  0x21   : > { %s293_s18 = sand.u32 1, %s1921_s29   ;;  %s1594_s21 = sshll.u32 %s1925_s30, 6 }
  0x22   : > { %s1543_s20 = sshll.u32 %s293_s18, 6  ;;  %s2876_s0 = sld [smem:[#allocation15_spill]] }
  0x23   : > { %s297_s25 = scalar_lea.vmem [#allocation2], %s1543_s20  ;;  %p2069_p9 = pnand %p1636_p7, %p45_p3 }
  0x24   : > { %s305_s26 = sshll.u32 %s297_s25, 4  ;;  %s294_s17 = scalar_lea.sflag [#allocation3], %s293_s18  ;;  %s306_s26 = int_to_ptr.vmem [resolvable:$true] %s305_s26 }
  0x25   : > { %p1797_p10 = pneg %p2069_p9 }
  0x28   : > { %s302_s24 = scalar_lea.hbm %s2876_s0, %s1594_s21  ;;  %s1800_s22 = scalar_lea.hbm %s2876_s0, 128 }
  0x29   : > { %s303_s10 = sshll.u32 %s302_s24, 4  ;;  %s304_s10 = int_to_ptr.hbm [resolvable:$true] %s303_s10 }
  0x2a   : > { %s1793_s3 = sshra.s32 %s304_s10, 4  ;;  %s1794_s3 = int_to_ptr.hbm [resolvable:$true] %s1793_s3 }
  0x2b   : > { %s1795_s5 = scalar_lea.hbm %s1794_s3, 64  ;;  %p1801_p0 = scmp.lt.s32.totalorder %s1794_s3, %s2876_s0 }
  0x2c   : > { %p1796_p2 = scmp.ne.s32.totalorder %s1794_s3, %s1795_s5  ;;  %p1802_p3 = scmp.lt.s32.totalorder %s1800_s22, %s1795_s5 }
  0x2e   : > { %p1798_p12 = pnand %p1797_p10, %p1796_p2  ;;  %p1803_p7 = por %p1802_p3, %p1801_p0 }
  0x30   : > { %p1799_p13 = pneg %p1798_p12 }
  0x32   : > { %p1804_p11 = pnand %p1803_p7, %p1799_p13 }
  0x34   : > { %1807 = shalt.err (!%p1804_p11)
}
  0x35   : > { %s1933_s18 = smov 256   ;;  %s1934_s25 = smov 16  }
  0x36   : > { %1626 = dma.hbm_to_vmem [thread:$0]  (!%p2069_p9), %s304_s10, 1024, %s306_s26, %s294_s17, %s1933_s18, %s1933_s18, %s1934_s25  }
  0x37   : > { %325 = sbr.rel (%p2033_p8) target bundleno = 873 (0x369), region = 48  ;;  %s2086_s21 = sand.u32 (!%p2033_p8), 1, %s1917_s28  }
  0x38   : > { %s2862_s3 = sshll.u32 (!%p2033_p8), %s2086_s21, 6  ;;  %s328_s5 = scalar_lea.sflag (!%p2033_p8), [#allocation3], %s2086_s21 }
  0x39   : > { %s2092_s20 = scalar_lea.vmem (!%p2033_p8), [#allocation2], %s2862_s3 }
  0x3c   : > { %1896 = dma.done.wait (%p2020_p4), %s328_s5, 1024  }
  0x3d   : > { %1898 = vsyncadd (%p2020_p4), %s328_s5, 4294966272 }
  0x3e   : > { %1900 = dma.done.wait (%p50_p1), [#allocation6], 2432  }
  0x3f   : > { %1902 = vsyncadd (%p50_p1), [#allocation6], 4294964864  ;;  %v2103_v0 = vld [vmem:[%s2092_s20 + $0x30] sm:$0xff]  ;;  %v2106_v1 = vld [vmem:[%s2092_s20 + $0x20] sm:$0xff]  ;;  %s1935_s11 = smov 111   ;;  %s1936_s16 = smov 112   ;;  %v414_v8 = vlaneseq }
  0x40   : > { %685 = vrot.lane.b32.xlu0 %v2103_v0, %s1935_s11  ;;  %683 = vrot.lane.b32.xlu1 %v2106_v1, %s1935_s11  ;;  %v2113_v2 = vld [vmem:[%s2092_s20 + $0x10] sm:$0xff]  ;;  %v2118_v3 = vld [vmem:[%s2092_s20 + $0x38] sm:$0xff]  ;;  %s1937_s26 = smov 1   ;;  %s1938_s10 = smov 113   ;;  %vm764_vm5 = vcmask 261120   ;;  %vm1118_vm9 = vcmask 588800  }
  0x41   : > { %681 = vrot.lane.b32.xlu2 %v2113_v2, %s1935_s11  ;;  %v2121_v4 = vld [vmem:[%s2092_s20 + $0x28] sm:$0xff]  ;;  %v2124_v5 = vld [vmem:[%s2092_s20 + $0x18] sm:$0xff]  ;;  %v2136_v7 = vld [vmem:[%s2092_s20] sm:$0xff]  ;;  %s1939_s14 = smov 15   ;;  %v2198_v10 = vand.u32 127, %v414_v8  ;;  %s1940_s23 = smov 127  }
  0x42   : > { %v2133_v6 = vld [vmem:[%s2092_s20 + $0x8] sm:$0xff]  ;;  %v1560_v11 = vld [vmem:[%s2855_s2 + $0x10] ss:$8 sm:$0x3]  ;;  %s2865_s24 = smov 16   ;;  %s2863_s22 = smov 17  }
  0x43   : > { %vm695_vm0 = vcmp.lt.s32.totalorder %v2198_v10, 111  ;;  %v708_v12 = vperm.slane %v1560_v11, 1  ;;  %v707_v20 = vperm.slane %v1560_v11, 0  ;;  %v1559_v41 = vld [vmem:[%s2855_s2 + $0x7] ss:$8 sm:$0x3] }
  0x44   : > { %vm655_vm1 = vcmp.lt.s32.totalorder %v2198_v10, 112  ;;  %v667_v42 = vperm.slane %v1559_v41, 0  ;;  %v668_v43 = vperm.slane %v1559_v41, 1  ;;  %v1556_v55 = vld [vmem:[%s2855_s2 + $0x3] ss:$8 sm:$0x3] }
  0x45   : > { %vm535_vm2 = vcmp.lt.s32.totalorder %v2198_v10, 1  ;;  %v2284_v56 = vperm.slane %v1556_v55, 0  ;;  %v2286_v57 = vperm.slane %v1556_v55, 1  ;;  %vm615_vm3 = vcmp.lt.s32.totalorder %v2198_v10, 113  ;;  %p385_p1 = scmp.lt.s32.totalorder %s2011_s9, 1  ;;  %s2878_s1 = sld [smem:[#allocation16_spill]] }
  0x46   : > { %vm495_vm4 = vcmp.lt.s32.totalorder %v2198_v10, 15  ;;  %vm575_vm6 = vcmp.lt.s32.totalorder %v2198_v10, 127  ;;  %vm455_vm7 = vcmp.lt.s32.totalorder %v2198_v10, 16  ;;  %vm416_vm8 = vcmp.lt.s32.totalorder %v2198_v10, 17  ;;  %v1092_v10 = vld [vmem:[#allocation7 + $0x10] sm:$0xff] }
  0x47   : > { %s386_s18 = scalar_select %p385_p1, %s2011_s9, 1 }
  0x48   : > { %693 = vrot.lane.b32.xlu0 %v2118_v3, %s1935_s11  ;;  %691 = vrot.lane.b32.xlu1 %v2121_v4, %s1935_s11 }
  0x49   : > { %689 = vrot.lane.b32.xlu2 %v2124_v5, %s1935_s11  ;;  %s1595_s25 = sshll.u32 %s386_s18, 4 }
  0x4b   : > { %s389_s3 = scalar_lea.vmem %s2878_s1, %s1595_s25 }
  0x50   : > { %687 = vrot.lane.b32.xlu1 %v2133_v6, %s1935_s11  ;;  %679 = vrot.lane.b32.xlu0 %v2136_v7, %s1935_s11 }
  0x51   : > { %645 = vrot.lane.b32.xlu2 %v2103_v0, %s1936_s16 }
  0x58   : > { %643 = vrot.lane.b32.xlu1 %v2106_v1, %s1936_s16  ;;  %653 = vrot.lane.b32.xlu0 %v2118_v3, %s1936_s16 }
  0x59   : > { %651 = vrot.lane.b32.xlu2 %v2121_v4, %s1936_s16 }
  0x60   : > { %533 = vrot.lane.b32.xlu1 %v2118_v3, %s1937_s26  ;;  %525 = vrot.lane.b32.xlu0 %v2103_v0, %s1937_s26 }
  0x61   : > { %641 = vrot.lane.b32.xlu2 %v2113_v2, %s1936_s16 }
  0x68   : > { %523 = vrot.lane.b32.xlu1 %v2106_v1, %s1937_s26  ;;  %649 = vrot.lane.b32.xlu0 %v2124_v5, %s1936_s16 }
  0x69   : > { %531 = vrot.lane.b32.xlu2 %v2121_v4, %s1937_s26 }
  0x70   : > { %647 = vrot.lane.b32.xlu1 %v2133_v6, %s1936_s16  ;;  %639 = vrot.lane.b32.xlu0 %v2136_v7, %s1936_s16 }
  0x71   : > { %521 = vrot.lane.b32.xlu2 %v2113_v2, %s1937_s26 }
  0x78   : > { %605 = vrot.lane.b32.xlu1 %v2103_v0, %s1938_s10  ;;  %529 = vrot.lane.b32.xlu0 %v2124_v5, %s1937_s26 }
  0x79   : > { %613 = vrot.lane.b32.xlu2 %v2118_v3, %s1938_s10 }
  0x80   : > { %527 = vrot.lane.b32.xlu1 %v2133_v6, %s1937_s26  ;;  %519 = vrot.lane.b32.xlu0 %v2136_v7, %s1937_s26 }
  0x81   : > { %603 = vrot.lane.b32.xlu2 %v2106_v1, %s1938_s10 }
  0x88   : > { %485 = vrot.lane.b32.xlu1 %v2103_v0, %s1939_s14  ;;  %611 = vrot.lane.b32.xlu0 %v2121_v4, %s1938_s10 }
  0x89   : > { %493 = vrot.lane.b32.xlu2 %v2118_v3, %s1939_s14 }
  0x90   : > { %609 = vrot.lane.b32.xlu1 %v2124_v5, %s1938_s10  ;;  %601 = vrot.lane.b32.xlu0 %v2113_v2, %s1938_s10 }
  0x91   : > { %483 = vrot.lane.b32.xlu2 %v2106_v1, %s1939_s14 }
  0x98   : > { %599 = vrot.lane.b32.xlu1 %v2136_v7, %s1938_s10  ;;  %491 = vrot.lane.b32.xlu0 %v2121_v4, %s1939_s14 }
  0x99   : > { %607 = vrot.lane.b32.xlu2 %v2133_v6, %s1938_s10 }
  0x9b   : > { %v682_v9 = vpop.permute.xlu2 %681 }
  0xa0   : > { %489 = vrot.lane.b32.xlu1 %v2124_v5, %s1939_s14  ;;  %481 = vrot.lane.b32.xlu0 %v2113_v2, %s1939_s14 }
  0xa1   : > { %565 = vrot.lane.b32.xlu2 %v2103_v0, %s1940_s23 }
  0xa3   : > { %v690_v13 = vpop.permute.xlu2 %689 }
  0xa4   : > { %v701_v14 = vsel %vm695_vm0, %v690_v13, %v682_v9  ;;  %v697_v31 = vsel %vm695_vm0, %v682_v9, %v690_v13 }
  0xa5   : > { %v2212_v15 = vmul.f32 %v708_v12, %v701_v14  ;;  %v713_v33 = vmul.f32 %v707_v20, %v697_v31  ;;  %v1558_v31 = vld [vmem:[%s2855_s2 + $0x6] ss:$8 sm:$0x3] }
  0xa8   : > { %479 = vrot.lane.b32.xlu1 %v2136_v7, %s1939_s14  ;;  %573 = vrot.lane.b32.xlu0 %v2118_v3, %s1940_s23 }
  0xa9   : > { %487 = vrot.lane.b32.xlu2 %v2133_v6, %s1939_s14 }
  0xab   : > { %v646_v16 = vpop.permute.xlu2 %645 }
  0xb0   : > { %571 = vrot.lane.b32.xlu1 %v2121_v4, %s1940_s23  ;;  %563 = vrot.lane.b32.xlu0 %v2106_v1, %s1940_s23 }
  0xb1   : > { %445 = vrot.lane.b32.xlu2 %v2103_v0, %s2865_s24 }
  0xb2   : > { %v686_v17 = vpop.permute.xlu0 %685  ;;  %v684_v18 = vpop.permute.xlu1 %683 }
  0xb3   : > { %v652_v19 = vpop.permute.xlu2 %651 }
  0xb8   : > { %561 = vrot.lane.b32.xlu1 %v2113_v2, %s1940_s23  ;;  %453 = vrot.lane.b32.xlu0 %v2118_v3, %s2865_s24 }
  0xb9   : > { %569 = vrot.lane.b32.xlu2 %v2124_v5, %s1940_s23 }
  0xba   : > { %v694_v21 = vpop.permute.xlu0 %693  ;;  %v692_v22 = vpop.permute.xlu1 %691 }
  0xbb   : > { %v703_v23 = vsel %vm695_vm0, %v694_v21, %v686_v17  ;;  %v698_v24 = vsel %vm695_vm0, %v684_v18, %v692_v22  ;;  %v702_v25 = vsel %vm695_vm0, %v692_v22, %v684_v18  ;;  %v699_v26 = vsel %vm695_vm0, %v686_v17, %v694_v21  ;;  %v2244_v30 = vpop.permute.xlu2 %641 }
  0xbc   : > { %v2240_v27 = vmul.f32 %v708_v12, %v703_v23  ;;  %v2242_v28 = vmul.f32 %v708_v12, %v702_v25  ;;  %v717_v29 = vmul.f32 %v707_v20, %v699_v26  ;;  %v715_v32 = vmul.f32 %v707_v20, %v698_v24 }
  0xbe   : > { %856 = vmatpush.msra.mxu2 %v717_v29 }
  0xc0   : > { %857 = vmatpush.msra.mxu2 %v715_v32  ;;  %451 = vrot.lane.b32.xlu1 %v2121_v4, %s2865_s24  ;;  %v2330_v32 = vperm.slane %v1558_v31, 0 }
  0xc1   : > { %443 = vrot.lane.b32.xlu0 %v2106_v1, %s2865_s24  ;;  %559 = vrot.lane.b32.xlu2 %v2136_v7, %s1940_s23 }
  0xc2   : > { %858 = vmatpush.msra.mxu2 %v713_v33  ;;  %v688_v34 = vpop.permute.xlu1 %687  ;;  %v680_v35 = vpop.permute.xlu0 %679  ;;  %v2332_v33 = vperm.slane %v1558_v31, 1 }
  0xc3   : > { %v696_v36 = vsel %vm695_vm0, %v680_v35, %v688_v34  ;;  %v700_v37 = vsel %vm695_vm0, %v688_v34, %v680_v35  ;;  %v532_v40 = vpop.permute.xlu2 %531 }
  0xc4   : > { %v2258_v38 = vmul.f32 %v708_v12, %v700_v37  ;;  %v711_v39 = vmul.f32 %v707_v20, %v696_v36 }
  0xc6   : > { %859 = vmatpush.msra.mxu2 %v711_v39 }
  0xc8   : > { %441 = vrot.lane.b32.xlu1 %v2113_v2, %s2865_s24 }
  0xc9   : > { %567 = vrot.lane.b32.xlu0 %v2133_v6, %s1940_s23  ;;  %449 = vrot.lane.b32.xlu2 %v2124_v5, %s2865_s24 }
  0xca   : > { %v644_v44 = vpop.permute.xlu1 %643  ;;  %v654_v45 = vpop.permute.xlu0 %653 }
  0xcb   : > { %v663_v46 = vsel %vm655_vm1, %v654_v45, %v646_v16  ;;  %v659_v47 = vsel %vm655_vm1, %v646_v16, %v654_v45  ;;  %v658_v48 = vsel %vm655_vm1, %v644_v44, %v652_v19  ;;  %v662_v49 = vsel %vm655_vm1, %v652_v19, %v644_v44  ;;  %v522_v53 = vpop.permute.xlu2 %521 }
  0xcc   : > { %v677_v50 = vmul.f32 %v667_v42, %v659_v47  ;;  %v678_v51 = vmul.f32 %v668_v43, %v663_v46  ;;  %v675_v52 = vmul.f32 %v667_v42, %v658_v48  ;;  %v676_v54 = vmul.f32 %v668_v43, %v662_v49 }
  0xce   : > { %812 = vmatpush.msra.mxu1 %v677_v50  ;;  %908 = vmatpush.msrb.mxu2 %v678_v51 }
  0xd0   : > { %447 = vrot.lane.b32.xlu1 %v2133_v6, %s2865_s24  ;;  %813 = vmatpush.msra.mxu1 %v675_v52  ;;  %v1555_v52 = vld [vmem:[%s2855_s2 + $0x2] ss:$8 sm:$0x3] }
  0xd1   : > { %439 = vrot.lane.b32.xlu0 %v2136_v7, %s2865_s24  ;;  %909 = vmatpush.msrb.mxu2 %v676_v54  ;;  %v2358_v54 = vperm.slane %v1555_v52, 0  ;;  %v2360_v55 = vperm.slane %v1555_v52, 1 }
  0xd2   : > { %v534_v58 = vpop.permute.xlu1 %533  ;;  %v526_v59 = vpop.permute.xlu0 %525  ;;  %404 = vrot.lane.b32.xlu2 %v2103_v0, %s2863_s22 }
  0xd3   : > { %v543_v60 = vsel %vm535_vm2, %v534_v58, %v526_v59  ;;  %v539_v61 = vsel %vm535_vm2, %v526_v59, %v534_v58  ;;  %v614_v8 = vpop.permute.xlu2 %613 }
  0xd4   : > { %v557_v62 = vmul.f32 %v2284_v56, %v543_v60  ;;  %v558_v63 = vmul.f32 %v2286_v57, %v539_v61 }
  0xd6   : > { %780 = vmatpush.msra.mxu0 %v557_v62  ;;  %876 = vmatpush.msra.mxu3 %v558_v63 }
  0xd8   : > { %402 = vrot.lane.b32.xlu1 %v2106_v1, %s2863_s22 }
  0xd9   : > { %412 = vrot.lane.b32.xlu0 %v2118_v3, %s2863_s22 }
  0xda   : > { %v524_v9 = vpop.permute.xlu1 %523  ;;  %v650_v11 = vpop.permute.xlu0 %649  ;;  %410 = vrot.lane.b32.xlu2 %v2121_v4, %s2863_s22 }
  0xdb   : > { %v657_v12 = vsel %vm655_vm1, %v2244_v30, %v650_v11  ;;  %v661_v13 = vsel %vm655_vm1, %v650_v11, %v2244_v30  ;;  %v538_v14 = vsel %vm535_vm2, %v524_v9, %v532_v40  ;;  %v542_v16 = vsel %vm535_vm2, %v532_v40, %v524_v9  ;;  %v604_v21 = vpop.permute.xlu2 %603 }
  0xdc   : > { %v673_v17 = vmul.f32 %v667_v42, %v657_v12  ;;  %v674_v18 = vmul.f32 %v668_v43, %v661_v13  ;;  %v555_v19 = vmul.f32 %v2284_v56, %v542_v16  ;;  %v556_v20 = vmul.f32 %v2286_v57, %v538_v14 }
  0xde   : > { %814 = vmatpush.msra.mxu1 %v673_v17  ;;  %910 = vmatpush.msrb.mxu2 %v674_v18 }
  0xdf   : > { %781 = vmatpush.msra.mxu0 %v555_v19  ;;  %877 = vmatpush.msra.mxu3 %v556_v20 }
  0xe0   : > { %408 = vrot.lane.b32.xlu1 %v2124_v5, %s2863_s22 }
  0xe1   : > { %400 = vrot.lane.b32.xlu0 %v2113_v2, %s2863_s22 }
  0xe2   : > { %v648_v22 = vpop.permute.xlu1 %647  ;;  %v640_v23 = vpop.permute.xlu0 %639  ;;  %398 = vrot.lane.b32.xlu2 %v2136_v7, %s2863_s22 }
  0xe3   : > { %v656_v24 = vsel %vm655_vm1, %v640_v23, %v648_v22  ;;  %v660_v25 = vsel %vm655_vm1, %v648_v22, %v640_v23  ;;  %v494_v30 = vpop.permute.xlu2 %493 }
  0xe4   : > { %v671_v26 = vmul.f32 %v667_v42, %v656_v24  ;;  %v672_v29 = vmul.f32 %v668_v43, %v660_v25 }
  0xe6   : > { %815 = vmatpush.msra.mxu1 %v671_v26  ;;  %911 = vmatpush.msrb.mxu2 %v672_v29 }
  0xe9   : > { %406 = vrot.lane.b32.xlu0 %v2133_v6, %s2863_s22  ;;  %s1551_s22 = sshll.u32 %s2086_s21, 4 }
  0xea   : > { %v606_v34 = vpop.permute.xlu1 %605  ;;  %v530_v35 = vpop.permute.xlu0 %529  ;;  %s2577_s18 = scalar_lea.vmem [#allocation9], %s1551_s22 }
  0xeb   : > { %v537_v36 = vsel %vm535_vm2, %v522_v53, %v530_v35  ;;  %v541_v37 = vsel %vm535_vm2, %v530_v35, %v522_v53  ;;  %v619_v39 = vsel %vm615_vm3, %v606_v34, %v614_v8  ;;  %v623_v40 = vsel %vm615_vm3, %v614_v8, %v606_v34  ;;  %v484_v45 = vpop.permute.xlu2 %483  ;;  %s1401_s22 = sshll.u32 %s2577_s18, 4  ;;  %s1402_s22 = int_to_ptr.vmem [resolvable:$true] %s1401_s22 }
  0xec   : > { %v553_v41 = vmul.f32 %v2284_v56, %v541_v37  ;;  %v554_v42 = vmul.f32 %v2286_v57, %v537_v36  ;;  %v637_v43 = vmul.f32 %v2330_v32, %v619_v39  ;;  %v638_v44 = vmul.f32 %v2332_v33, %v623_v40  ;;  %v2396_v39 = vld [vmem:[#allocation5 + $0x10] sm:$0xff] }
  0xed   : > { %1561 = vmatmul.msk.f32.vlgmr.msra.gmra.mxu2 %vm764_vm5, %v2396_v39 }
  0xee   : > { %782 = vmatpush.msra.mxu0 %v553_v41  ;;  %878 = vmatpush.msra.mxu3 %v554_v42 }
  0xef   : > { %816 = vmatpush.msra.mxu1 %v637_v43  ;;  %912 = vmatpush.msrb.mxu2 %v638_v44 }
  0xf2   : > { %v528_v46 = vpop.permute.xlu1 %527  ;;  %v520_v47 = vpop.permute.xlu0 %519 }
  0xf3   : > { %v536_v48 = vsel %vm535_vm2, %v520_v47, %v528_v46  ;;  %v540_v49 = vsel %vm535_vm2, %v528_v46, %v520_v47  ;;  %v608_v53 = vpop.permute.xlu2 %607 }
  0xf4   : > { %v551_v50 = vmul.f32 %v2284_v56, %v540_v49  ;;  %v552_v51 = vmul.f32 %v2286_v57, %v536_v48 }
  0xf6   : > { %783 = vmatpush.msra.mxu0 %v551_v50  ;;  %879 = vmatpush.msra.mxu3 %v552_v51  ;;  %v2418_v50 = vld [vmem:[#allocation5 + $0x28] sm:$0xff] }
  0xf7   : > { %1562 = vmatmul.msk.f32.gmra.mxu2 %vm764_vm5, %v2418_v50 }
  0xfa   : > { %v486_v58 = vpop.permute.xlu1 %485  ;;  %v612_v59 = vpop.permute.xlu0 %611 }
  0xfb   : > { %v618_v56 = vsel %vm615_vm3, %v604_v21, %v612_v59  ;;  %v622_v57 = vsel %vm615_vm3, %v612_v59, %v604_v21  ;;  %v499_v60 = vsel %vm495_vm4, %v486_v58, %v494_v30  ;;  %v503_v61 = vsel %vm495_vm4, %v494_v30, %v486_v58  ;;  %v566_v11 = vpop.permute.xlu2 %565 }
  0xfc   : > { %v635_v62 = vmul.f32 %v2330_v32, %v618_v56  ;;  %v636_v63 = vmul.f32 %v2332_v33, %v622_v57  ;;  %v517_v8 = vmul.f32 %v2358_v54, %v503_v61  ;;  %v518_v9 = vmul.f32 %v2360_v55, %v499_v60 }
  0xfe   : > { %817 = vmatpush.msra.mxu1 %v635_v62  ;;  %913 = vmatpush.msrb.mxu2 %v636_v63  ;;  %v2430_v62 = vld [vmem:[#allocation5 + $0x40] sm:$0xff] }
  0xff   : > { %784 = vmatpush.msra.mxu0 %v517_v8  ;;  %880 = vmatpush.msra.mxu3 %v518_v9  ;;  %v1554_v63 = vld [vmem:[%s2855_s2 + $0x1] ss:$8 sm:$0x3] }
 0x100   : > { %1563 = vmatmul.msk.f32.gmra.mxu2 %vm764_vm5, %v2430_v62  ;;  %v467_v8 = vperm.slane %v1554_v63, 0  ;;  %v468_v9 = vperm.slane %v1554_v63, 1 }
 0x102   : > { %v610_v12 = vpop.permute.xlu1 %609  ;;  %v602_v13 = vpop.permute.xlu0 %601 }
 0x103   : > { %v617_v14 = vsel %vm615_vm3, %v602_v13, %v610_v12  ;;  %v621_v16 = vsel %vm615_vm3, %v610_v12, %v602_v13  ;;  %v488_v25 = vpop.permute.xlu2 %487 }
 0x104   : > { %v633_v17 = vmul.f32 %v2330_v32, %v617_v14  ;;  %v634_v18 = vmul.f32 %v2332_v33, %v621_v16 }
 0x106   : > { %818 = vmatpush.msra.mxu1 %v633_v17  ;;  %914 = vmatpush.msrb.mxu2 %v634_v18 }
 0x10a   : > { %v600_v19 = vpop.permute.xlu1 %599  ;;  %v492_v20 = vpop.permute.xlu0 %491 }
 0x10b   : > { %v498_v21 = vsel %vm495_vm4, %v484_v45, %v492_v20  ;;  %v502_v22 = vsel %vm495_vm4, %v492_v20, %v484_v45  ;;  %v616_v23 = vsel %vm615_vm3, %v600_v19, %v608_v53  ;;  %v620_v24 = vsel %vm615_vm3, %v608_v53, %v600_v19  ;;  %v446_v41 = vpop.permute.xlu2 %445 }
 0x10c   : > { %v515_v26 = vmul.f32 %v2358_v54, %v502_v22  ;;  %v516_v29 = vmul.f32 %v2360_v55, %v498_v21  ;;  %v631_v30 = vmul.f32 %v2330_v32, %v616_v23  ;;  %v632_v31 = vmul.f32 %v2332_v33, %v620_v24  ;;  %v1557_v33 = vld [vmem:[%s2855_s2 + $0x5] ss:$8 sm:$0x3]  ;;  %v2450_v23 = vld [vmem:[#allocation5 + $0x58] sm:$0xff] }
 0x10d   : > { %v2406_v42 = vperm.slane %v1557_v33, 0  ;;  %v2408_v43 = vperm.slane %v1557_v33, 1  ;;  %1564 = vmatmul.msk.f32.gmra.mxu2 %vm764_vm5, %v2450_v23 }
 0x10e   : > { %785 = vmatpush.msra.mxu0 %v515_v26  ;;  %881 = vmatpush.msra.mxu3 %v516_v29 }
 0x10f   : > { %819 = vmatpush.msra.mxu1 %v631_v30  ;;  %915 = vmatpush.msrb.mxu2 %v632_v31  ;;  %v2458_v31 = vld [vmem:[#allocation5 + $0x70] sm:$0xff] }
 0x112   : > { %v490_v34 = vpop.permute.xlu1 %489  ;;  %v482_v35 = vpop.permute.xlu0 %481 }
 0x113   : > { %v497_v36 = vsel %vm495_vm4, %v482_v35, %v490_v34  ;;  %v501_v37 = vsel %vm495_vm4, %v490_v34, %v482_v35  ;;  %v570_v59 = vpop.permute.xlu2 %569 }
 0x114   : > { %v513_v40 = vmul.f32 %v2358_v54, %v501_v37  ;;  %v514_v32 = vmul.f32 %v2360_v55, %v497_v36 }
 0x115   : > { %1565 = vmatmul.msk.f32.gmra.mxu2 %vm764_vm5, %v2458_v31 }
 0x116   : > { %786 = vmatpush.msra.mxu0 %v513_v40  ;;  %882 = vmatpush.msra.mxu3 %v514_v32 }
 0x11a   : > { %v480_v44 = vpop.permute.xlu1 %479  ;;  %v574_v45 = vpop.permute.xlu0 %573 }
 0x11b   : > { %v579_v46 = vsel %vm575_vm6, %v566_v11, %v574_v45  ;;  %v583_v47 = vsel %vm575_vm6, %v574_v45, %v566_v11  ;;  %v496_v48 = vsel %vm495_vm4, %v480_v44, %v488_v25  ;;  %v500_v49 = vsel %vm495_vm4, %v488_v25, %v480_v44  ;;  %v560_v11 = vpop.permute.xlu2 %559 }
 0x11c   : > { %v597_v51 = vmul.f32 %v2406_v42, %v579_v46  ;;  %v598_v52 = vmul.f32 %v2408_v43, %v583_v47  ;;  %v511_v53 = vmul.f32 %v2358_v54, %v500_v49  ;;  %v512_v58 = vmul.f32 %v2360_v55, %v496_v48 }
 0x11e   : > { %820 = vmatpush.msra.mxu1 %v597_v51  ;;  %916 = vmatpush.msrb.mxu2 %v598_v52 }
 0x11f   : > { %787 = vmatpush.msra.mxu0 %v511_v53  ;;  %883 = vmatpush.msra.mxu3 %v512_v58 }
 0x122   : > { %v572_v56 = vpop.permute.xlu1 %571  ;;  %v564_v57 = vpop.permute.xlu0 %563 }
 0x123   : > { %v578_v60 = vsel %vm575_vm6, %v564_v57, %v572_v56  ;;  %v582_v61 = vsel %vm575_vm6, %v572_v56, %v564_v57  ;;  %v450_v30 = vpop.permute.xlu2 %449 }
 0x124   : > { %v595_v54 = vmul.f32 %v2406_v42, %v578_v60  ;;  %v596_v55 = vmul.f32 %v2408_v43, %v582_v61 }
 0x126   : > { %821 = vmatpush.msra.mxu1 %v595_v54  ;;  %917 = vmatpush.msrb.mxu2 %v596_v55  ;;  %v723_v55 = vld [vmem:[#allocation5 + $0x20] sm:$0xff] }
 0x12a   : > { %v562_v12 = vpop.permute.xlu1 %561  ;;  %v454_v13 = vpop.permute.xlu0 %453 }
 0x12b   : > { %v459_v14 = vsel %vm455_vm7, %v446_v41, %v454_v13  ;;  %v463_v16 = vsel %vm455_vm7, %v454_v13, %v446_v41  ;;  %v577_v17 = vsel %vm575_vm6, %v562_v12, %v570_v59  ;;  %v581_v18 = vsel %vm575_vm6, %v570_v59, %v562_v12 }
 0x12c   : > { %v477_v19 = vmul.f32 %v467_v8, %v463_v16  ;;  %v478_v20 = vmul.f32 %v468_v9, %v459_v14  ;;  %v593_v21 = vmul.f32 %v2406_v42, %v577_v17  ;;  %v594_v22 = vmul.f32 %v2408_v43, %v581_v18  ;;  %v405_v48 = vpop.permute.xlu2 %404  ;;  %v726_v14 = vld [vmem:[#allocation5 + $0x38] sm:$0xff] }
 0x12e   : > { %788 = vmatpush.msra.mxu0 %v477_v19  ;;  %884 = vmatpush.msra.mxu3 %v478_v20 }
 0x12f   : > { %822 = vmatpush.msra.mxu1 %v593_v21  ;;  %918 = vmatpush.msrb.mxu2 %v594_v22  ;;  %v719_v22 = vld [vmem:[#allocation5] sm:$0xff] }
 0x132   : > { %v452_v24 = vpop.permute.xlu1 %451 }
 0x133   : > { %v444_v25 = vpop.permute.xlu0 %443 }
 0x134   : > { %v458_v26 = vsel %vm455_vm7, %v444_v25, %v452_v24  ;;  %v462_v29 = vsel %vm455_vm7, %v452_v24, %v444_v25  ;;  %v729_v24 = vld [vmem:[#allocation5 + $0x50] sm:$0xff]  ;;  %v738_v25 = vld [vmem:[%s2857_s4 + $0x20] sm:$0xff] }
 0x135   : > { %v475_v34 = vmul.f32 %v467_v8, %v462_v29  ;;  %v476_v35 = vmul.f32 %v468_v9, %v458_v26  ;;  %v1943_v26 = vmov 0   ;;  %v722_v29 = vld [vmem:[#allocation5 + $0x18] sm:$0xff] }
 0x136   : > { %1690 = vset.pattern.permute.xlu1 %v1943_v26  ;;  %1691 = vset.pattern.permute.xlu0 %v1943_v26 }
 0x137   : > { %789 = vmatpush.msra.mxu0 %v475_v34  ;;  %885 = vmatpush.msra.mxu3 %v476_v35  ;;  %v731_v34 = vld [vmem:[#allocation5 + $0x60] sm:$0xff] }
 0x138   : > { %761 = vperm.xlu1 %1690, %v738_v25   ;;  %1692 = vset.pattern.permute.xlu2 %v1943_v26  ;;  %v1575_v26 = vld [vmem:[%s2855_s2 + $0x6] ss:$8 sm:$0x3] }
 0x13a   : > { %v442_v36 = vpop.permute.xlu1 %441 }
 0x13b   : > { %v568_v37 = vpop.permute.xlu0 %567  ;;  %v457_v40 = vsel %vm455_vm7, %v442_v36, %v450_v30  ;;  %v461_v32 = vsel %vm455_vm7, %v450_v30, %v442_v36  ;;  %v732_v30 = vld [vmem:[#allocation5 + $0x68] sm:$0xff] }
 0x13c   : > { %v576_v33 = vsel %vm575_vm6, %v560_v11, %v568_v37  ;;  %v580_v41 = vsel %vm575_vm6, %v568_v37, %v560_v11  ;;  %v473_v44 = vmul.f32 %v467_v8, %v461_v32  ;;  %v474_v45 = vmul.f32 %v468_v9, %v457_v40 }
 0x13d   : > { %v591_v46 = vmul.f32 %v2406_v42, %v576_v33  ;;  %v592_v47 = vmul.f32 %v2408_v43, %v580_v41 }
 0x13e   : > { %790 = vmatpush.msra.mxu0 %v473_v44  ;;  %886 = vmatpush.msra.mxu3 %v474_v45 }
 0x13f   : > { %823 = vmatpush.msra.mxu1 %v591_v46  ;;  %919 = vmatpush.msrb.mxu2 %v592_v47 }
 0x141   : > { %920 = vmatpush.msrb.mxu2 %v2118_v3  ;;  %824 = vmatpush.msra.mxu1 %v2103_v0  ;;  %v425_v0 = vld [vmem:[%s2855_s2] ss:$8 sm:$0x3] }
 0x142   : > { %v448_v49 = vpop.permute.xlu1 %447  ;;  %v720_v3 = vld [vmem:[#allocation5 + $0x8] sm:$0xff] }
 0x143   : > { %921 = vmatpush.msrb.mxu2 %v2121_v4  ;;  %v440_v51 = vpop.permute.xlu0 %439  ;;  %825 = vmatpush.msra.mxu1 %v2106_v1  ;;  %v411_v1 = vpop.permute.xlu2 %410  ;;  %v427_v4 = vperm.slane %v425_v0, 0 }
 0x144   : > { %v456_v42 = vsel %vm455_vm7, %v440_v51, %v448_v49  ;;  %v460_v43 = vsel %vm455_vm7, %v448_v49, %v440_v51 }
 0x145   : > { %922 = vmatpush.msrb.mxu2 %v2124_v5  ;;  %v471_v52 = vmul.f32 %v467_v8, %v460_v43  ;;  %v472_v53 = vmul.f32 %v468_v9, %v456_v42  ;;  %826 = vmatpush.msra.mxu1 %v2113_v2  ;;  %v428_v5 = vperm.slane %v425_v0, 1 }
 0x147   : > { %791 = vmatpush.msra.mxu0 %v471_v52  ;;  %887 = vmatpush.msra.mxu3 %v472_v53 }
 0x148   : > { %923 = vmatpush.msrb.mxu2 %v2133_v6  ;;  %827 = vmatpush.msra.mxu1 %v2136_v7 }
 0x149   : > { %828 = vmatmul.f32.vlgmr.msra.gmra.mxu1 %v720_v3  ;;  %924 = vmatmul.f32.vlgmr.msrb.gmra.mxu2 %v720_v3 }
 0x14a   : > { %1598 = vmatpush.msra.mxu2 %v2240_v27  ;;  %v403_v2 = vpop.permute.xlu1 %402 }
 0x14b   : > { %v413_v58 = vpop.permute.xlu0 %412  ;;  %v419_v59 = vsel %vm416_vm8, %v403_v2, %v411_v1  ;;  %v423_v6 = vsel %vm416_vm8, %v411_v1, %v403_v2  ;;  %v399_v16 = vpop.permute.xlu2 %398  ;;  %v972_v1 = vld [vmem:[%s389_s3] sm:$0xff] }
 0x14c   : > { %1599 = vmatpush.msra.mxu2 %v2242_v28  ;;  %v420_v7 = vsel %vm416_vm8, %v405_v48, %v413_v58  ;;  %v424_v56 = vsel %vm416_vm8, %v413_v58, %v405_v48  ;;  %v435_v61 = vmul.f32 %v427_v4, %v423_v6  ;;  %v436_v54 = vmul.f32 %v428_v5, %v419_v59 }
 0x14d   : > { %v437_v57 = vmul.f32 %v427_v4, %v424_v56  ;;  %v438_v60 = vmul.f32 %v428_v5, %v420_v7  ;;  %v973_v7 = vld [vmem:[%s389_s3 + $0x8] sm:$0xff]  ;;  %s2879_s3 = smov 17  }
 0x14e   : > { %1600 = vmatpush.msra.mxu2 %v2212_v15 }
 0x14f   : > { %792 = vmatpush.msra.mxu0 %v437_v57  ;;  %888 = vmatpush.msra.mxu3 %v438_v60  ;;  %v1095_v60 = vld [vmem:[%s2859_s6 + $0x8] sm:$0xff] }
 0x150   : > { %1601 = vmatpush.msra.mxu2 %v2258_v38 }
 0x151   : > { %793 = vmatpush.msra.mxu0 %v435_v61  ;;  %831 = vmatmul.f32.gmra.mxu1 %v723_v55  ;;  %v1094_v61 = vld [vmem:[%s2859_s6] sm:$0xff] }
 0x152   : > { %v409_v63 = vpop.permute.xlu1 %408  ;;  %889 = vmatpush.msra.mxu3 %v436_v54  ;;  %927 = vmatmul.f32.gmra.mxu2 %v723_v55  ;;  %v1097_v54 = vld [vmem:[%s2859_s6 + $0x18] sm:$0xff]  ;;  %v735_v55 = vld [vmem:[%s2857_s4 + $0x8] sm:$0xff] }
 0x153   : > { %v401_v8 = vpop.permute.xlu0 %400 }
 0x154   : > { %v418_v9 = vsel %vm416_vm8, %v401_v8, %v409_v63  ;;  %v422_v11 = vsel %vm416_vm8, %v409_v63, %v401_v8  ;;  %v1096_v63 = vld [vmem:[%s2859_s6 + $0x10] sm:$0xff] }
 0x155   : > { %v433_v12 = vmul.f32 %v427_v4, %v422_v11  ;;  %v434_v13 = vmul.f32 %v428_v5, %v418_v9  ;;  %v736_v8 = vld [vmem:[%s2857_s4 + $0x10] sm:$0xff]  ;;  %v734_v9 = vld [vmem:[%s2857_s4] sm:$0xff]  ;;  %v737_v11 = vld [vmem:[%s2857_s4 + $0x18] sm:$0xff] }
 0x157   : > { %794 = vmatpush.msra.mxu0 %v433_v12  ;;  %890 = vmatpush.msra.mxu3 %v434_v13 }
 0x159   : > { %834 = vmatmul.f32.gmra.mxu1 %v726_v14 }
 0x15a   : > { %930 = vmatmul.f32.gmra.mxu2 %v726_v14 }
 0x15b   : > { %v407_v17 = vpop.permute.xlu0 %406 }
 0x15c   : > { %v417_v18 = vsel %vm416_vm8, %v399_v16, %v407_v17  ;;  %v421_v19 = vsel %vm416_vm8, %v407_v17, %v399_v16 }
 0x15d   : > { %v431_v20 = vmul.f32 %v427_v4, %v421_v19  ;;  %v432_v21 = vmul.f32 %v428_v5, %v417_v18 }
 0x15f   : > { %795 = vmatpush.msra.mxu0 %v431_v20  ;;  %891 = vmatpush.msra.mxu3 %v432_v21  ;;  %v1577_v21 = vld [vmem:[%s2855_s2 + $0x10] ss:$8 sm:$0x3] }
 0x160   : > { %796 = vmatmul.f32.vlgmr.msra.gmra.mxu0 %v719_v22  ;;  %892 = vmatmul.f32.vlgmr.msra.gmra.mxu3 %v719_v22  ;;  %v1576_v22 = vld [vmem:[%s2855_s2 + $0x7] ss:$8 sm:$0x3]  ;;  %v1085_v25 = vperm.slane %v1577_v21, 1 }
 0x161   : > { %952 = vmatpush.msrb.mxu0 %v2240_v27  ;;  %837 = vmatmul.f32.gmra.mxu1 %v729_v24  ;;  %v725_v27 = vld [vmem:[#allocation5 + $0x30] sm:$0xff] }
 0x162   : > { %933 = vmatmul.f32.gmra.mxu2 %v729_v24  ;;  %v1084_v24 = vperm.slane %v1577_v21, 0 }
 0x163   : > { %953 = vmatpush.msrb.mxu0 %v2242_v28  ;;  %v728_v28 = vld [vmem:[#allocation5 + $0x48] sm:$0xff] }
 0x165   : > { %954 = vmatpush.msrb.mxu0 %v2212_v15 }
 0x167   : > { %955 = vmatpush.msrb.mxu0 %v2258_v38 }
 0x168   : > { %799 = vmatmul.f32.gmra.mxu0 %v722_v29  ;;  %895 = vmatmul.f32.gmra.mxu3 %v722_v29 }
 0x169   : > { %840 = vmatmul.f32.gmra.mxu1 %v732_v30 }
 0x16a   : > { %936 = vmatmul.f32.gmra.mxu2 %v732_v30 }
 0x170   : > { %802 = vmatmul.f32.gmra.mxu0 %v725_v27  ;;  %898 = vmatmul.f32.gmra.mxu3 %v725_v27  ;;  %v2525_v15 = vpop.f32.mrf.mxu2  ;;  %v1070_v27 = vperm.slane %v1576_v22, 0 }
 0x172   : > { %1570 = vmatmul.msk.f32.vlgmr.msra.gmra.mxu2 %vm764_vm5, %v2458_v31 }
 0x178   : > { %805 = vmatmul.f32.gmra.mxu0 %v728_v28  ;;  %901 = vmatmul.f32.gmra.mxu3 %v728_v28  ;;  %v1071_v28 = vperm.slane %v1576_v22, 1 }
 0x17a   : > { %v2527_v38 = vpop.f32.mrf.mxu2 }
 0x180   : > { %808 = vmatmul.f32.gmra.mxu0 %v731_v34  ;;  %904 = vmatmul.f32.gmra.mxu3 %v731_v34 }
 0x183   : > { %v2529_v31 = vpop.f32.mrf.mxu2 }
 0x188   : > { %1566 = vmatmul.msk.f32.vlgmr.msrb.gmra.mxu0 %vm764_vm5, %v2396_v39 }
 0x190   : > { %1567 = vmatmul.msk.f32.gmra.mxu0 %vm764_vm5, %v2418_v50  ;;  %v2531_v35 = vpop.f32.mrf.mxu2 }
 0x198   : > { %1568 = vmatmul.msk.f32.gmra.mxu0 %vm764_vm5, %v2430_v62  ;;  %v873_v36 = vpop.f32.mrf.mxu2 }
 0x1a0   : > { %1569 = vmatmul.msk.f32.gmra.mxu0 %vm764_vm5, %v2450_v23 }
 0x1aa   : > { %v762_v51 = vpop.permute.xlu1 %761 }
 0x1c6   : > { %v2535_v50 = vpop.f32.mrf.mxu1 }
 0x1cc   : > { %v2533_v39 = vpop.f32.mrf.mxu2 }
 0x1ce   : > { %v2541_v23 = vpop.f32.mrf.mxu1 }
 0x1d5   : > { %v2539_v62 = vpop.f32.mrf.mxu2 }
 0x1d6   : > { %v2549_v41 = vpop.f32.mrf.mxu1 }
 0x1dd   : > { %v2537_v37 = vpop.f32.mrf.mxu0  ;;  %v2547_v33 = vpop.f32.mrf.mxu2 }
 0x1de   : > { %v2559_v48 = vpop.f32.mrf.mxu1 }
 0x1e3   : > { %v2543_v40 = vpop.f32.mrf.mxu3 }
 0x1e5   : > { %v2545_v32 = vpop.f32.mrf.mxu0  ;;  %v2555_v46 = vpop.f32.mrf.mxu2 }
 0x1e6   : > { %v841_v53 = vpop.f32.mrf.mxu1 }
 0x1eb   : > { %v2551_v44 = vpop.f32.mrf.mxu3 }
 0x1ed   : > { %v2553_v45 = vpop.f32.mrf.mxu0  ;;  %v937_v43 = vpop.f32.mrf.mxu2 }
 0x1f3   : > { %v2557_v47 = vpop.f32.mrf.mxu3 }
 0x1f5   : > { %v2562_v49 = vpop.f32.mrf.mxu0  ;;  %v969_v59 = vpop.f32.mrf.mxu2 }
 0x1fb   : > { %v2565_v42 = vpop.f32.mrf.mxu3 }
 0x1fd   : > { %v809_v52 = vpop.f32.mrf.mxu0 }
 0x1fe   : > { %v810_v0 = vadd.f32 %v809_v52, %v762_v51 }
 0x200   : > { %v842_v3 = vadd.f32 %v841_v53, %v810_v0  ;;  %v1056_v0 = vperm.slane %v1575_v26, 0 }
 0x202   : > { %v874_v4 = vadd.f32 %v873_v36, %v842_v3  ;;  %v1057_v3 = vperm.slane %v1575_v26, 1 }
 0x203   : > { %v905_v5 = vpop.f32.mrf.mxu3 }
 0x204   : > { %v2571_v2 = vadd.f32 %v972_v1, %v874_v4  ;;  %v906_v58 = vadd.f32 %v905_v5, %v762_v51  ;;  %v1574_v5 = vld [vmem:[%s2855_s2 + $0x5] ss:$8 sm:$0x3] }
 0x206   : > { %1048 = vrot.lane.b32.xlu0 %v2571_v2, %s1938_s10  ;;  %1062 = vrot.lane.b32.xlu1 %v2571_v2, %s1936_s16  ;;  %v938_v6 = vadd.f32 %v937_v43, %v906_v58  ;;  %976 = vst [vmem:[%s2577_s18] sm:$0xff] %v2571_v2 }
 0x207   : > { %1076 = vrot.lane.b32.xlu2 %v2571_v2, %s1935_s11 }
 0x208   : > { %v970_v56 = vadd.f32 %v969_v59, %v938_v6 }
 0x20a   : > { %v2583_v57 = vadd.f32 %v973_v7, %v970_v56 }
 0x20c   : > { %977 = vst [vmem:[%s2577_s18 + $0x8] sm:$0xff] %v2583_v57 }
 0x20e   : > { %1006 = vrot.lane.b32.xlu0 %v2571_v2, %s1939_s14  ;;  %1020 = vrot.lane.b32.xlu1 %v2571_v2, %s1937_s26 }
 0x20f   : > { %1034 = vrot.lane.b32.xlu2 %v2571_v2, %s1940_s23 }
 0x216   : > { %1050 = vrot.lane.b32.xlu1 %v2583_v57, %s1938_s10  ;;  %1078 = vrot.lane.b32.xlu0 %v2583_v57, %s1935_s11  ;;  %s1597_s11 = sshll.u32 %s2011_s9, 4 }
 0x217   : > { %992 = vrot.lane.b32.xlu2 %v2571_v2, %s2865_s24 }
 0x21e   : > { %1008 = vrot.lane.b32.xlu1 %v2583_v57, %s1939_s14  ;;  %1036 = vrot.lane.b32.xlu0 %v2583_v57, %s1940_s23  ;;  %s1399_s14 = scalar_lea.hbm %s2861_s8, %s1597_s11  ;;  %s1371_s23 = scalar_lea.sflag [#allocation10], %s2086_s21 }
 0x21f   : > { %1064 = vrot.lane.b32.xlu2 %v2583_v57, %s1936_s16  ;;  %s1403_s16 = sshll.u32 %s1399_s14, 4  ;;  %s1404_s16 = int_to_ptr.hbm [resolvable:$true] %s1403_s16 }
 0x220   : > { %s1837_s25 = sshra.s32 %s1404_s16, 4  ;;  %s1838_s25 = int_to_ptr.hbm [resolvable:$true] %s1837_s25 }
 0x221   : > { %s1839_s5 = scalar_lea.hbm %s1838_s25, 16  ;;  %p1844_p9 = scmp.lt.s32.totalorder %s1838_s25, %s2861_s8 }
 0x222   : > { %p1840_p4 = scmp.ne.s32.totalorder %s1838_s25, %s1839_s5 }
 0x224   : > { %p1841_p8 = pnand %p1840_p4, %p2059_p5 }
 0x226   : > { %978 = vrot.lane.b32.xlu1 %v2571_v2, %s2879_s3  ;;  %994 = vrot.lane.b32.xlu0 %v2583_v57, %s2865_s24  ;;  %p1842_p11 = pneg %p1841_p8  ;;  %s1843_s24 = scalar_lea.hbm %s2861_s8, 32 }
 0x227   : > { %1022 = vrot.lane.b32.xlu2 %v2583_v57, %s1937_s26  ;;  %p1845_p2 = scmp.lt.s32.totalorder %s1843_s24, %s1839_s5 }
 0x229   : > { %p1846_p10 = por %p1845_p2, %p1844_p9 }
 0x22b   : > { %p1847_p12 = pnand %p1846_p10, %p1842_p11 }
 0x22e   : > { %1105 = vperm.xlu1 %1690, %v1095_v60   ;;  %1100 = vperm.xlu0 %1691, %v1094_v61   ;;  %v1042_v60 = vperm.slane %v1574_v5, 0  ;;  %v1043_v61 = vperm.slane %v1574_v5, 1 }
 0x22f   : > { %980 = vrot.lane.b32.xlu2 %v2583_v57, %s2879_s3 }
 0x236   : > { %1115 = vperm.xlu1 %1690, %v1097_v54   ;;  %746 = vperm.xlu0 %1691, %v735_v55   ;;  %v1573_v54 = vld [vmem:[%s2855_s2 + $0x3] ss:$8 sm:$0x3] }
 0x237   : > { %1110 = vperm.xlu2 %1692, %v1096_v63  }
 0x23e   : > { %751 = vperm.xlu1 %1690, %v736_v8  }
 0x23f   : > { %741 = vperm.xlu2 %1692, %v734_v9  }
 0x247   : > { %756 = vperm.xlu2 %1692, %v737_v11   ;;  %v1572_v11 = vld [vmem:[%s2855_s2 + $0x2] ss:$8 sm:$0x3] }
 0x261   : > { %v1077_v12 = vpop.permute.xlu2 %1076 }
 0x269   : > { %v1035_v13 = vpop.permute.xlu2 %1034 }
 0x271   : > { %v2637_v17 = vpop.permute.xlu2 %992 }
 0x278   : > { %v1049_v14 = vpop.permute.xlu0 %1048  ;;  %v1063_v16 = vpop.permute.xlu1 %1062 }
 0x279   : > { %v1065_v20 = vpop.permute.xlu2 %1064 }
 0x27a   : > { %v1066_v34 = vsel %vm655_vm1, %v1063_v16, %v1065_v20  ;;  %v1067_v36 = vsel %vm655_vm1, %v1065_v20, %v1063_v16  ;;  %v1028_v16 = vperm.slane %v1573_v54, 0  ;;  %v1029_v20 = vperm.slane %v1573_v54, 1 }
 0x27b   : > { %v1074_v58 = vmul.f32 %v1070_v27, %v1066_v34  ;;  %v1075_v59 = vmul.f32 %v1071_v28, %v1067_v36 }
 0x280   : > { %v1007_v18 = vpop.permute.xlu0 %1006  ;;  %v1021_v19 = vpop.permute.xlu1 %1020 }
 0x281   : > { %v1023_v6 = vpop.permute.xlu2 %1022 }
 0x282   : > { %v1024_v21 = vsel %vm535_vm2, %v1021_v19, %v1023_v6  ;;  %v1025_v22 = vsel %vm535_vm2, %v1023_v6, %v1021_v19 }
 0x283   : > { %v1032_v19 = vmul.f32 %v1028_v16, %v1025_v22  ;;  %v1033_v27 = vmul.f32 %v1029_v20, %v1024_v21 }
 0x288   : > { %v1051_v29 = vpop.permute.xlu1 %1050  ;;  %v1079_v30 = vpop.permute.xlu0 %1078 }
 0x289   : > { %v1080_v51 = vsel %vm695_vm0, %v1077_v12, %v1079_v30  ;;  %v1081_v43 = vsel %vm695_vm0, %v1079_v30, %v1077_v12  ;;  %v1052_v1 = vsel %vm615_vm3, %v1049_v14, %v1051_v29  ;;  %v1053_v4 = vsel %vm615_vm3, %v1051_v29, %v1049_v14  ;;  %v984_v30 = vld [vmem:[%s2855_s2] ss:$8 sm:$0x3]  ;;  %v981_v34 = vpop.permute.xlu2 %980 }
 0x28a   : > { %v1088_v52 = vmul.f32 %v1084_v24, %v1080_v51  ;;  %v1089_v53 = vmul.f32 %v1085_v25, %v1081_v43  ;;  %v1060_v7 = vmul.f32 %v1056_v0, %v1052_v1  ;;  %v1061_v56 = vmul.f32 %v1057_v3, %v1053_v4  ;;  %v1571_v24 = vld [vmem:[%s2855_s2 + $0x1] ss:$8 sm:$0x3] }
 0x28b   : > { %v1015_v25 = vperm.slane %v1572_v11, 1  ;;  %v1000_v28 = vperm.slane %v1571_v24, 0  ;;  %v1001_v36 = vperm.slane %v1571_v24, 1  ;;  %v987_v3 = vperm.slane %v984_v30, 1 }
 0x28c   : > { %1138 = vmatpush.msrb.mxu1 %v1088_v52  ;;  %1167 = vmatpush.msrb.mxu3 %v1089_v53 }
 0x28e   : > { %1139 = vmatpush.msrb.mxu1 %v1074_v58  ;;  %1168 = vmatpush.msrb.mxu3 %v1075_v59  ;;  %v1090_v59 = vld [vmem:[#allocation7] sm:$0xff] }
 0x290   : > { %v1009_v55 = vpop.permute.xlu1 %1008  ;;  %1140 = vmatpush.msrb.mxu1 %v1060_v7  ;;  %1169 = vmatpush.msrb.mxu3 %v1061_v56  ;;  %v1037_v63 = vpop.permute.xlu0 %1036  ;;  %v1093_v7 = vld [vmem:[#allocation7 + $0x18] sm:$0xff] }
 0x291   : > { %v1038_v8 = vsel %vm575_vm6, %v1035_v13, %v1037_v63  ;;  %v1039_v9 = vsel %vm575_vm6, %v1037_v63, %v1035_v13  ;;  %v1014_v13 = vperm.slane %v1572_v11, 0  ;;  %v1010_v26 = vsel %vm495_vm4, %v1007_v18, %v1009_v55 }
 0x292   : > { %v1046_v12 = vmul.f32 %v1042_v60, %v1038_v8  ;;  %v1047_v14 = vmul.f32 %v1043_v61, %v1039_v9  ;;  %v1011_v29 = vsel %vm495_vm4, %v1009_v55, %v1007_v18  ;;  %v1019_v53 = vmul.f32 %v1015_v25, %v1010_v26 }
 0x293   : > { %v1018_v52 = vmul.f32 %v1014_v13, %v1011_v29  ;;  %v986_v18 = vperm.slane %v984_v30, 0 }
 0x294   : > { %1141 = vmatpush.msrb.mxu1 %v1046_v12  ;;  %1170 = vmatpush.msrb.mxu3 %v1047_v14 }
 0x296   : > { %1142 = vmatpush.msrb.mxu1 %v2571_v2  ;;  %1171 = vmatpush.msrb.mxu3 %v2583_v57 }
 0x298   : > { %v979_v51 = vpop.permute.xlu1 %978  ;;  %1143 = vmatpush.msrb.mxu1 %v1032_v19  ;;  %1172 = vmatpush.msrb.mxu3 %v1033_v27  ;;  %v995_v43 = vpop.permute.xlu0 %994 }
 0x299   : > { %v983_v0 = vsel %vm416_vm8, %v981_v34, %v979_v51  ;;  %v996_v2 = vsel %vm455_vm7, %v2637_v17, %v995_v43  ;;  %v997_v57 = vsel %vm455_vm7, %v995_v43, %v2637_v17  ;;  %v982_v1 = vsel %vm416_vm8, %v979_v51, %v981_v34  ;;  %v1091_v17 = vld [vmem:[#allocation7 + $0x8] sm:$0xff] }
 0x29a   : > { %1144 = vmatpush.msrb.mxu1 %v1018_v52  ;;  %1173 = vmatpush.msrb.mxu3 %v1019_v53  ;;  %v1004_v4 = vmul.f32 %v1000_v28, %v997_v57  ;;  %v1005_v5 = vmul.f32 %v1001_v36, %v996_v2  ;;  %v990_v58 = vmul.f32 %v986_v18, %v983_v0 }
 0x29b   : > { %v991_v6 = vmul.f32 %v987_v3, %v982_v1 }
 0x29c   : > { %1145 = vmatpush.msrb.mxu1 %v1004_v4  ;;  %1174 = vmatpush.msrb.mxu3 %v1005_v5 }
 0x29e   : > { %1146 = vmatpush.msrb.mxu1 %v990_v58  ;;  %1175 = vmatpush.msrb.mxu3 %v991_v6 }
 0x29f   : > { %1578 = vmatmul.msk.f32.vlgmr.msrb.gmra.mxu1 %vm1118_vm9, %v1090_v59  ;;  %1582 = vmatmul.msk.f32.vlgmr.msrb.gmra.mxu3 %vm1118_vm9, %v1090_v59 }
 0x2a7   : > { %1579 = vmatmul.msk.f32.gmra.mxu1 %vm1118_vm9, %v1091_v17  ;;  %1583 = vmatmul.msk.f32.gmra.mxu3 %vm1118_vm9, %v1091_v17 }
 0x2af   : > { %1580 = vmatmul.msk.f32.gmra.mxu1 %vm1118_vm9, %v1092_v10  ;;  %1584 = vmatmul.msk.f32.gmra.mxu3 %vm1118_vm9, %v1092_v10 }
 0x2b7   : > { %1581 = vmatmul.msk.f32.gmra.mxu1 %vm1118_vm9, %v1093_v7  ;;  %1585 = vmatmul.msk.f32.gmra.mxu3 %vm1118_vm9, %v1093_v7 }
 0x2b8   : > { %1850 = shalt.err (!%p1847_p12)
}
 0x2b9   : > { %1613 = dma.vmem_to_hbm [thread:$0]  (%p2059_p5), %s1402_s22, 256, %s1404_s16, %s1371_s23   ;;  %v1101_v56 = vpop.permute.xlu0 %1100  ;;  %v1111_v63 = vpop.permute.xlu2 %1110 }
 0x2ba   : > { %v1106_v9 = vpop.permute.xlu1 %1105  ;;  %v957_v7 = vpop.f32.mrf.mxu0  ;;  %s2880_s0 = sshll.u32 %s2086_s21, 6  ;;  %s1596_s24 = sshll.u32 %s2011_s9, 6 }
 0x2bb   : > { %s2756_s1 = scalar_lea.vmem [#allocation8], %s2880_s0  ;;  %s1382_s10 = scalar_lea.hbm %s2860_s7, %s1596_s24 }
 0x2bc   : > { %s1383_s9 = sshll.u32 %s2756_s1, 4  ;;  %s1385_s3 = sshll.u32 %s1382_s10, 4  ;;  %s1384_s9 = int_to_ptr.vmem [resolvable:$true] %s1383_s9  ;;  %s1386_s3 = int_to_ptr.hbm [resolvable:$true] %s1385_s3 }
 0x2bd   : > { %s1366_s14 = scalar_lea.sflag [#allocation4], %s2086_s21  ;;  %s1865_s22 = sshra.s32 %s1386_s3, 4  ;;  %s1866_s22 = int_to_ptr.hbm [resolvable:$true] %s1865_s22 }
 0x2be   : > { %s1867_s16 = scalar_lea.hbm %s1866_s22, 64  ;;  %s1871_s5 = scalar_lea.hbm %s2860_s7, 128 }
 0x2bf   : > { %p1868_p13 = scmp.ne.s32.totalorder %s1866_s22, %s1867_s16  ;;  %p1872_p7 = scmp.lt.s32.totalorder %s1866_s22, %s2860_s7 }
 0x2c0   : > { %p1873_p1 = scmp.lt.s32.totalorder %s1871_s5, %s1867_s16 }
 0x2c1   : > { %v742_v29 = vpop.permute.xlu2 %741  ;;  %v2717_v52 = vpop.permute.xlu0 %746  ;;  %p1869_p0 = pnand %p1868_p13, %p2059_p5 }
 0x2c2   : > { %v798_v36 = vadd.f32 %v2537_v37, %v742_v29  ;;  %v894_v51 = vadd.f32 %v2543_v40, %v742_v29  ;;  %v2726_v5 = vpop.permute.xlu1 %1115  ;;  %v801_v40 = vadd.f32 %v2545_v32, %v2717_v52  ;;  %p1874_p4 = por %p1873_p1, %p1872_p7 }
 0x2c3   : > { %p1870_p3 = pneg %p1869_p0 }
 0x2c4   : > { %v830_v4 = vadd.f32 %v2535_v50, %v798_v36  ;;  %v926_v37 = vadd.f32 %v2533_v39, %v894_v51  ;;  %v833_v32 = vadd.f32 %v2541_v23, %v801_v40  ;;  %v1725_v36 = vld [vmem:[%s2092_s20] sm:$0xff] }
 0x2c5   : > { %p1875_p8 = pnand %p1874_p4, %p1870_p3 }
 0x2c6   : > { %v862_v50 = vadd.f32 %v2525_v15, %v830_v4 }
 0x2c9   : > { %v2761_v40 = vpop.permute.xlu2 %756 }
 0x31c   : > { %v1148_v60 = vpop.f32.mrf.mxu1 }
 0x31d   : > { %v1149_v61 = vadd.f32 %v1148_v60, %v1101_v56  ;;  %v2733_v60 = vadd.f32 %v957_v7, %v926_v37 }
 0x31f   : > { %v1189_v54 = vsub.f32 0.0, %v1149_v61 }
 0x321   : > { %v1197_v55 = vmul.f32 1.442695, %v1189_v54 }
 0x322   : > { %v1177_v8 = vpop.f32.mrf.mxu3 }
 0x323   : > { %1693 = vpow2.f32 %v1197_v55  ;;  %v1178_v11 = vadd.f32 %v1177_v8, %v1101_v56 }
 0x324   : > { %v1151_v12 = vpop.f32.mrf.mxu1 }
 0x325   : > { %v1152_v14 = vadd.f32 %v1151_v12, %v1106_v9  ;;  %v1190_v16 = vsub.f32 0.0, %v1178_v11 }
 0x327   : > { %v1191_v20 = vsub.f32 0.0, %v1152_v14  ;;  %v1199_v21 = vmul.f32 1.442695, %v1190_v16 }
 0x329   : > { %v1694_v22 = vpop.eup %1693  ;;  %v1201_v24 = vmul.f32 1.442695, %v1191_v20  ;;  %1695 = vpow2.f32 %v1199_v21 }
 0x32a   : > { %v1213_v13 = vadd.f32 1.0, %v1694_v22  ;;  %v1180_v25 = vpop.f32.mrf.mxu3 }
 0x32b   : > { %1697 = vpow2.f32 %v1201_v24  ;;  %v1181_v30 = vadd.f32 %v1180_v25, %v1106_v9 }
 0x32c   : > { %1699 = vrcp.f32 %v1213_v13  ;;  %v1154_v26 = vpop.f32.mrf.mxu1  ;;  %v1230_v6 = vand.u32 2147483647, %v1213_v13  ;;  %v1232_v17 = vand.u32 2147483648, %v1213_v13  ;;  %vm1226_vm10 = vweird.f32 %v1213_v13 }
 0x32d   : > { %v1155_v19 = vadd.f32 %v1154_v26, %v1111_v63  ;;  %v1192_v27 = vsub.f32 0.0, %v1181_v30 }
 0x32e   : > { %vm1231_vm12 = vcmp.eq.f32.partialorder %v1230_v6, 8.507059e+37  ;;  %v1233_v8 = vor.u32 1.1754944e-38, %v1232_v17 }
 0x32f   : > { %v1193_v28 = vsub.f32 0.0, %v1155_v19  ;;  %v1696_v34 = vpop.eup %1695  ;;  %v1203_v18 = vmul.f32 1.442695, %v1192_v27  ;;  %v752_v27 = vpop.permute.xlu1 %751 }
 0x330   : > { %v2719_v53 = vadd.f32 1.0, %v1696_v34 }
 0x331   : > { %v1698_v43 = vpop.eup %1697  ;;  %v1205_v57 = vmul.f32 1.442695, %v1193_v28 }
 0x332   : > { %v1700_v0 = vpop.eup %1699  ;;  %v2721_v2 = vadd.f32 1.0, %v1698_v43  ;;  %1701 = vrcp.f32 %v2719_v53  ;;  %v1183_v1 = vpop.f32.mrf.mxu3  ;;  %v1245_v12 = vand.u32 2147483647, %v2719_v53  ;;  %v1247_v14 = vand.u32 2147483648, %v2719_v53 }
 0x333   : > { %v1222_v3 = vmul.f32 %v1700_v0, %v1213_v13  ;;  %v1184_v10 = vadd.f32 %v1183_v1, %v1111_v63  ;;  %vm1227_vm11 = vweird.f32 %v1700_v0  ;;  %vm1241_vm0 = vweird.f32 %v2719_v53 }
 0x334   : > { %1703 = vrcp.f32 %v2721_v2  ;;  %v1157_v58 = vpop.f32.mrf.mxu1  ;;  %vm1228_vm13 = vmor %vm1226_vm10, %vm1227_vm11  ;;  %v1260_v23 = vand.u32 2147483647, %v2721_v2  ;;  %v1262_v34 = vand.u32 2147483648, %v2721_v2  ;;  %v804_v1 = vadd.f32 %v2553_v45, %v752_v27 }
 0x335   : > { %v1223_v59 = vsub.f32 1.0, %v1222_v3  ;;  %1705 = vpow2.f32 %v1203_v18  ;;  %v1158_v39 = vadd.f32 %v1157_v58, %v2726_v5  ;;  %v1194_v61 = vsub.f32 0.0, %v1184_v10 }
 0x336   : > { %1707 = vpow2.f32 %v1205_v57  ;;  %v897_v57 = vadd.f32 %v2551_v44, %v2717_v52  ;;  %v1248_v4 = vor.u32 1.1754944e-38, %v1247_v14  ;;  %vm1256_vm2 = vweird.f32 %v2721_v2 }
 0x337   : > { %v1224_v56 = vmul.f32 %v1700_v0, %v1223_v59  ;;  %v1195_v9 = vsub.f32 0.0, %v1158_v39  ;;  %v1207_v16 = vmul.f32 1.442695, %v1194_v61  ;;  %vm1246_vm3 = vcmp.eq.f32.partialorder %v1245_v12, 8.507059e+37  ;;  %v1726_v61 = vld [vmem:[%s2092_s20 + $0x8] sm:$0xff] }
 0x338   : > { %v1702_v54 = vpop.eup %1701  ;;  %v1263_v52 = vor.u32 1.1754944e-38, %v1262_v34  ;;  %vm1261_vm5 = vcmp.eq.f32.partialorder %v1260_v23, 8.507059e+37  ;;  %v807_v39 = vadd.f32 %v2562_v49, %v2761_v40 }
 0x339   : > { %v1225_v55 = vadd.f32 %v1700_v0, %v1224_v56  ;;  %v1237_v63 = vmul.f32 %v1702_v54, %v2719_v53  ;;  %v1209_v22 = vmul.f32 1.442695, %v1195_v9  ;;  %1709 = vpow2.f32 %v1207_v16 }
 0x33a   : > { %v1704_v11 = vpop.eup %1703  ;;  %vm1242_vm14 = vweird.f32 %v1702_v54  ;;  %v1186_v18 = vpop.f32.mrf.mxu3  ;;  %v900_v9 = vadd.f32 %v2557_v47, %v752_v27 }
 0x33b   : > { %v1706_v15 = vpop.eup %1705  ;;  %v1229_v20 = vsel %vm1228_vm13, %v1700_v0, %v1225_v55  ;;  %v1252_v21 = vmul.f32 %v1704_v11, %v2721_v2  ;;  %v1238_v25 = vsub.f32 1.0, %v1237_v63  ;;  %1711 = vpow2.f32 %v1209_v22  ;;  %vm1243_vm1 = vmor %vm1241_vm0, %vm1242_vm14 }
 0x33c   : > { %v1708_v24 = vpop.eup %1707  ;;  %v1234_v13 = vsel %vm1231_vm12, %v1233_v8, %v1229_v20  ;;  %v2741_v26 = vadd.f32 1.0, %v1706_v15  ;;  %vm1257_vm15 = vweird.f32 %v1704_v11  ;;  %v865_v0 = vadd.f32 %v2527_v38, %v833_v32 }
 0x33d   : > { %v1341_v29 = vmul.f32 %v1234_v13, %v862_v50  ;;  %v1253_v30 = vsub.f32 1.0, %v1252_v21  ;;  %v2743_v19 = vadd.f32 1.0, %v1708_v24  ;;  %v1239_v28 = vmul.f32 %v1702_v54, %v1238_v25  ;;  %vm1258_vm4 = vmor %vm1256_vm2, %vm1257_vm15 }
 0x33e   : > { %1713 = vrcp.f32 %v2741_v26  ;;  %v1187_v45 = vadd.f32 %v1186_v18, %v2726_v5  ;;  %v929_v32 = vadd.f32 %v2539_v62, %v897_v57  ;;  %v836_v8 = vadd.f32 %v2549_v41, %v804_v1  ;;  %v960_v62 = vpop.f32.mrf.mxu0 }
 0x33f   : > { %v1349_v51 = vadd.f32 %v1725_v36, %v1341_v29  ;;  %v1254_v43 = vmul.f32 %v1704_v11, %v1253_v30  ;;  %1715 = vrcp.f32 %v2743_v19  ;;  %v1240_v3 = vadd.f32 %v1702_v54, %v1239_v28  ;;  %v1710_v38 = vpop.eup %1709 }
 0x340   : > { %v2765_v6 = vadd.f32 1.0, %v1710_v38  ;;  %v1196_v55 = vsub.f32 0.0, %v1187_v45  ;;  %v1275_v12 = vand.u32 2147483647, %v2741_v26  ;;  %v1277_v14 = vand.u32 2147483648, %v2741_v26 }
 0x341   : > { %1357 = vst [vmem:[%s2756_s1] sm:$0xff] %v1349_v51  ;;  %v1255_v37 = vadd.f32 %v1704_v11, %v1254_v43  ;;  %v1244_v44 = vsel %vm1243_vm1, %v1702_v54, %v1240_v3  ;;  %v1712_v53 = vpop.eup %1711  ;;  %vm1286_vm7 = vweird.f32 %v2743_v19  ;;  %v1292_v41 = vand.u32 2147483648, %v2743_v19 }
 0x342   : > { %v1249_v58 = vsel %vm1246_vm3, %v1248_v4, %v1244_v44  ;;  %v2768_v7 = vadd.f32 1.0, %v1712_v53  ;;  %1717 = vrcp.f32 %v2765_v6  ;;  %v1290_v20 = vand.u32 2147483647, %v2743_v19  ;;  %v1728_v4 = vld [vmem:[%s2092_s20 + $0x18] sm:$0xff] }
 0x343   : > { %v1259_v59 = vsel %vm1258_vm4, %v1704_v11, %v1255_v37  ;;  %v1342_v2 = vmul.f32 %v1249_v58, %v2733_v60  ;;  %v1727_v11 = vld [vmem:[%s2092_s20 + $0x10] sm:$0xff]  ;;  %v1211_v21 = vmul.f32 1.442695, %v1196_v55  ;;  %v961_v22 = vadd.f32 %v960_v62, %v929_v32 }
 0x344   : > { %v1714_v17 = vpop.eup %1713  ;;  %v1264_v10 = vsel %vm1261_vm5, %v1263_v52, %v1259_v59  ;;  %1719 = vrcp.f32 %v2768_v7  ;;  %v932_v24 = vadd.f32 %v2547_v33, %v900_v9  ;;  %vm1271_vm9 = vweird.f32 %v2741_v26  ;;  %v1729_v52 = vld [vmem:[%s2092_s20 + $0x20] sm:$0xff] }
 0x345   : > { %v1716_v56 = vpop.eup %1715  ;;  %v1343_v5 = vmul.f32 %v1264_v10, %v865_v0  ;;  %v1267_v50 = vmul.f32 %v1714_v17, %v2741_v26  ;;  %v1350_v54 = vadd.f32 %v1726_v61, %v1342_v2  ;;  %vm1272_vm6 = vweird.f32 %v1714_v17 }
 0x346   : > { %v1282_v60 = vmul.f32 %v1716_v56, %v2743_v19  ;;  %vm1287_vm8 = vweird.f32 %v1716_v56  ;;  %vm1273_vm10 = vmor %vm1271_vm9, %vm1272_vm6  ;;  %v1278_v25 = vor.u32 1.1754944e-38, %v1277_v14  ;;  %1721 = vpow2.f32 %v1211_v21 }
 0x347   : > { %v1351_v63 = vadd.f32 %v1727_v11, %v1343_v5  ;;  %v1268_v49 = vsub.f32 1.0, %v1267_v50  ;;  %1358 = vst [vmem:[%s2756_s1 + $0x8] sm:$0xff] %v1350_v54  ;;  %v868_v27 = vadd.f32 %v2529_v31, %v836_v8  ;;  %vm1276_vm11 = vcmp.eq.f32.partialorder %v1275_v12, 8.507059e+37  ;;  %vm1288_vm12 = vmor %vm1286_vm7, %vm1287_vm8 }
 0x348   : > { %v1283_v16 = vsub.f32 1.0, %v1282_v60  ;;  %v1718_v23 = vpop.eup %1717  ;;  %v1293_v34 = vor.u32 1.1754944e-38, %v1292_v41  ;;  %vm1291_vm13 = vcmp.eq.f32.partialorder %v1290_v20, 8.507059e+37  ;;  %v1307_v0 = vand.u32 2147483648, %v2765_v6  ;;  %v1730_v60 = vld [vmem:[%s2092_s20 + $0x28] sm:$0xff] }
 0x349   : > { %1359 = vst [vmem:[%s2756_s1 + $0x10] sm:$0xff] %v1351_v63  ;;  %v1269_v15 = vmul.f32 %v1714_v17, %v1268_v49  ;;  %v1297_v30 = vmul.f32 %v1718_v23, %v2765_v6  ;;  %vm1302_vm14 = vweird.f32 %v1718_v23  ;;  %v1305_v19 = vand.u32 2147483647, %v2765_v6  ;;  %v1731_v63 = vld [vmem:[%s2092_s20 + $0x30] sm:$0xff] }
 0x34a   : > { %v1284_v47 = vmul.f32 %v1716_v56, %v1283_v16  ;;  %v1720_v33 = vpop.eup %1719  ;;  %v839_v1 = vadd.f32 %v2559_v48, %v807_v39  ;;  %vm1301_vm15 = vweird.f32 %v2765_v6  ;;  %v1320_v58 = vand.u32 2147483647, %v2768_v7 }
 0x34b   : > { %v1270_v13 = vadd.f32 %v1714_v17, %v1269_v15  ;;  %v1298_v26 = vsub.f32 1.0, %v1297_v30  ;;  %v1312_v31 = vmul.f32 %v1720_v33, %v2768_v7  ;;  %v1322_v59 = vand.u32 2147483648, %v2768_v7  ;;  %vm1303_vm0 = vmor %vm1301_vm15, %vm1302_vm14 }
 0x34c   : > { %v1285_v29 = vadd.f32 %v1716_v56, %v1284_v47  ;;  %v1722_v44 = vpop.eup %1721  ;;  %v1308_v2 = vor.u32 1.1754944e-38, %v1307_v0  ;;  %vm1317_vm1 = vweird.f32 %v1720_v33  ;;  %vm1306_vm2 = vcmp.eq.f32.partialorder %v1305_v19, 8.507059e+37 }
 0x34d   : > { %v1274_v28 = vsel %vm1273_vm10, %v1714_v17, %v1270_v13  ;;  %v1299_v3 = vmul.f32 %v1718_v23, %v1298_v26  ;;  %v1313_v38 = vsub.f32 1.0, %v1312_v31  ;;  %v963_v17 = vpop.f32.mrf.mxu0  ;;  %v1220_v10 = vadd.f32 1.0, %v1722_v44 }
 0x34e   : > { %v1279_v36 = vsel %vm1276_vm11, %v1278_v25, %v1274_v28  ;;  %v1289_v51 = vsel %vm1288_vm12, %v1716_v56, %v1285_v29  ;;  %v964_v6 = vadd.f32 %v963_v17, %v932_v24  ;;  %vm1316_vm3 = vweird.f32 %v2768_v7 }
 0x34f   : > { %v1344_v43 = vmul.f32 %v1279_v36, %v961_v22  ;;  %v1294_v18 = vsel %vm1291_vm13, %v1293_v34, %v1289_v51  ;;  %v1300_v53 = vadd.f32 %v1718_v23, %v1299_v3  ;;  %v1314_v48 = vmul.f32 %v1720_v33, %v1313_v38  ;;  %vm1318_vm4 = vmor %vm1316_vm3, %vm1317_vm1 }
 0x350   : > { %v1345_v57 = vmul.f32 %v1294_v18, %v868_v27  ;;  %1723 = vrcp.f32 %v1220_v10  ;;  %v1323_v32 = vor.u32 1.1754944e-38, %v1322_v59  ;;  %v871_v61 = vadd.f32 %v2531_v35, %v839_v1 }
 0x351   : > { %v1352_v37 = vadd.f32 %v1728_v4, %v1344_v43  ;;  %v1304_v56 = vsel %vm1303_vm0, %v1718_v23, %v1300_v53  ;;  %v1315_v5 = vadd.f32 %v1720_v33, %v1314_v48  ;;  %vm1321_vm5 = vcmp.eq.f32.partialorder %v1320_v58, 8.507059e+37  ;;  %v1732_v23 = vld [vmem:[%s2092_s20 + $0x38] sm:$0xff] }
 0x352   : > { %v1353_v45 = vadd.f32 %v1729_v52, %v1345_v57  ;;  %v1309_v39 = vsel %vm1306_vm2, %v1308_v2, %v1304_v56  ;;  %v903_v7 = vadd.f32 %v2565_v42, %v2761_v40  ;;  %v1337_v16 = vand.u32 2147483648, %v1220_v10 }
 0x353   : > { %1360 = vst [vmem:[%s2756_s1 + $0x18] sm:$0xff] %v1352_v37  ;;  %v1346_v50 = vmul.f32 %v1309_v39, %v964_v6  ;;  %v1319_v54 = vsel %vm1318_vm4, %v1720_v33, %v1315_v5  ;;  %v1335_v15 = vand.u32 2147483647, %v1220_v10  ;;  %vm1331_vm7 = vweird.f32 %v1220_v10 }
 0x354   : > { %1361 = vst [vmem:[%s2756_s1 + $0x20] sm:$0xff] %v1353_v45  ;;  %v1324_v8 = vsel %vm1321_vm5, %v1323_v32, %v1319_v54  ;;  %v935_v35 = vadd.f32 %v2555_v46, %v903_v7  ;;  %v1338_v42 = vor.u32 1.1754944e-38, %v1337_v16 }
 0x355   : > { %v1354_v55 = vadd.f32 %v1730_v60, %v1346_v50  ;;  %v1347_v9 = vmul.f32 %v1324_v8, %v871_v61  ;;  %v966_v41 = vpop.f32.mrf.mxu0  ;;  %vm1336_vm9 = vcmp.eq.f32.partialorder %v1335_v15, 8.507059e+37 }
 0x356   : > { %v1724_v11 = vpop.eup %1723  ;;  %v967_v40 = vadd.f32 %v966_v41, %v935_v35 }
 0x357   : > { %1362 = vst [vmem:[%s2756_s1 + $0x28] sm:$0xff] %v1354_v55  ;;  %v1355_v49 = vadd.f32 %v1731_v63, %v1347_v9  ;;  %v1327_v12 = vmul.f32 %v1724_v11, %v1220_v10  ;;  %vm1332_vm6 = vweird.f32 %v1724_v11 }
 0x358   : > { %vm1333_vm8 = vmor %vm1331_vm7, %vm1332_vm6 }
 0x359   : > { %1363 = vst [vmem:[%s2756_s1 + $0x30] sm:$0xff] %v1355_v49  ;;  %v1328_v14 = vsub.f32 1.0, %v1327_v12 }
 0x35b   : > { %v1329_v62 = vmul.f32 %v1724_v11, %v1328_v14 }
 0x35d   : > { %v1330_v47 = vadd.f32 %v1724_v11, %v1329_v62 }
 0x35f   : > { %v1334_v20 = vsel %vm1333_vm8, %v1724_v11, %v1330_v47 }
 0x360   : > { %v1339_v46 = vsel %vm1336_vm9, %v1338_v42, %v1334_v20 }
 0x361   : > { %v1348_v21 = vmul.f32 %v1339_v46, %v967_v40 }
 0x363   : > { %v1356_v22 = vadd.f32 %v1732_v23, %v1348_v21 }
 0x365   : > { %1364 = vst [vmem:[%s2756_s1 + $0x38] sm:$0xff] %v1356_v22 }
 0x366   : > { %1878 = shalt.err (!%p1875_p8)
}
 0x367   : > { %s1944_s21 = smov 256   ;;  %s2881_s20 = smov 16  }
 0x368   : > { %1612 = dma.vmem_to_hbm [thread:$0]  (%p2059_p5), %s1384_s9, 1024, %s1386_s3, %s1366_s14, %s1944_s21, %s1944_s21, %s2881_s20  }
 0x369 PF: > { %s1415_s0 = sand.u32 1, %s1913_s27   ;;  %p2882_p11 = scmp.ge.s32.totalorder %s1925_s30, 2 }
 0x36a   : > { %s1416_s1 = scalar_lea.sflag [#allocation4], %s1415_s0 }
 0x36b   : > { %p1628_p9 = pnand %p2882_p11, %p2025_p6 }
 0x36d   : > { %p1629_p2 = pneg %p1628_p9 }
 0x36f   : > { %1904 = dma.done.wait (%p1629_p2), %s1416_s1, 1024  }
 0x370   : > { %1906 = vsyncadd (%p1629_p2), %s1416_s1, 4294966272  ;;  %s1426_s24 = scalar_lea.sflag [#allocation10], %s1415_s0 }
 0x371   : > { %1908 = dma.done.wait (%p1629_p2), %s1426_s24, 256  }
 0x372   : > { %1910 = vsyncadd (%p1629_p2), %s1426_s24, 4294967040  ;;  %p26_p5 = scmp.ge.s32.totalorder %s2046_s13, 4   ;;  %s2883_s27 = smov %s1917_s28 }
 0x373   : > { %s2884_s28 = smov %s1921_s29  ;;  %s2885_s29 = smov %s2055_s19 }
 0x374   : > { %s2886_s30 = smov %s2046_s13  ;;  %28 = sbr.rel (!%p26_p5) target bundleno = 13 (0xd), region = 128 }
 0x379   :  { %1432 = vsyncpa [#allocation3], 1 }
 0x37a   :  { %1434 = vsyncpa [#allocation3 + $0x1], 1 }
 0x37b   :  { %1435 = vsyncpa [#allocation6], 1 }
 0x37c   :  { %1436 = vsyncpa [#allocation4], 1 }
 0x37d   :  { %1438 = vsyncpa [#allocation4 + $0x1], 1 }
 0x37e   :  { %1439 = vsyncpa [#allocation10], 1 }
 0x37f   :  { %1441 = vsyncpa [#allocation10 + $0x1], 1 }

</bundles_post_ra>
